<compile_context>
chip_gen: v7x
topology: tpu7x:2x2x1
jax: 0.10.0
libtpu: 0.0.40
codegen_flags: <defaults>
</compile_context>

<pallas_src>
import functools

import jax
import jax.numpy as jnp
from jax.experimental import pallas as pl
from jax.experimental.pallas import tpu as pltpu

jax.config.update("jax_default_matmul_precision", "highest")


def _pick_hw_tile(hw, max_tile=512):
    """Largest 128-aligned tile <= max_tile that divides hw (else the full hw)."""
    if hw % 128 != 0:
        return hw
    t = min(max_tile, hw)
    t -= t % 128
    while hw % t != 0:
        t -= 128
    return t


# ----------------------------------------------------------------------------- 
# Kernel 1: 1x1 conv (pointwise projection) as a matmul over HW tiles.
# -----------------------------------------------------------------------------
def _pointwise_kernel(x_ref, w_ref, b_ref, o_ref):
    # x_ref: (Cin, T_HW), w_ref: (Cout, Cin), b_ref: (Cout, 1), o_ref: (Cout, T_HW)
    acc = jnp.dot(w_ref[...], x_ref[...], preferred_element_type=jnp.float32)
    o_ref[...] = (acc + b_ref[...]).astype(o_ref.dtype)


def pointwise_conv(x_flat, w, b, t_hw):
    """1x1 conv: x (B, Cin, HW), w (Cout, Cin), b (Cout,) -> (B, Cout, HW)."""
    B, Cin, HW = x_flat.shape
    Cout = w.shape[0]
    n_s = HW // t_hw
    b2 = b.reshape(Cout, 1).astype(jnp.float32)
    return pl.pallas_call(
        _pointwise_kernel,
        out_shape=jax.ShapeDtypeStruct((B, Cout, HW), x_flat.dtype),
        grid_spec=pltpu.PrefetchScalarGridSpec(
            num_scalar_prefetch=0,
            grid=(B, n_s),
            in_specs=[
                pl.BlockSpec((None, Cin, t_hw), lambda bb, s: (bb, 0, s)),
                pl.BlockSpec((Cout, Cin), lambda bb, s: (0, 0)),
                pl.BlockSpec((Cout, 1), lambda bb, s: (0, 0)),
            ],
            out_specs=pl.BlockSpec((None, Cout, t_hw), lambda bb, s: (bb, 0, s)),
        ),
        compiler_params=pltpu.CompilerParams(
            dimension_semantics=("parallel", "parallel")),
        cost_estimate=pl.CostEstimate(
            flops=2 * B * Cout * Cin * HW,
            transcendentals=0,
            bytes_accessed=4 * (B * Cin * HW + Cout * Cin + Cout + B * Cout * HW)),
    )(x_flat, w, b2)


# ----------------------------------------------------------------------------- 
# 3x3 depthwise conv (qkv_dwconv).
# TODO(synk): depthwise 3x3 conv left to XLA's grouped conv; a halo'd Pallas kernel
# could fuse it with the qkv 1x1 projection to save an HBM round trip.
# -----------------------------------------------------------------------------
def depthwise_conv3x3(x, w, b):
    """x: (B, C, H, W), w: (C, 1, 3, 3), b: (C,), padding=1, groups=C."""
    out = jax.lax.conv_general_dilated(
        x, w, window_strides=(1, 1), padding=((1, 1), (1, 1)),
        dimension_numbers=("NCHW", "OIHW", "NCHW"),
        feature_group_count=x.shape[1])
    return out + b[None, :, None, None]


# ----------------------------------------------------------------------------- 
# Kernel 2: per (batch, head) channel-attention matrix.
#   Accumulates q@k^T, ||q_row||^2, ||k_row||^2 over HW tiles (innermost axis),
#   then normalizes (F.normalize semantics, eps=1e-12), scales by temperature,
#   and softmaxes over the channel axis.
# -----------------------------------------------------------------------------
def _attn_stats_kernel(q_ref, k_ref, t_ref, attn_ref, qk_acc, qsq_acc, ksq_acc):
    s = pl.program_id(2)

    @pl.when(s == 0)
    def _():
        qk_acc[...] = jnp.zeros_like(qk_acc)
        qsq_acc[...] = jnp.zeros_like(qsq_acc)
        ksq_acc[...] = jnp.zeros_like(ksq_acc)

    q = q_ref[...].astype(jnp.float32)          # (c_head, T_HW)
    k = k_ref[...].astype(jnp.float32)          # (c_head, T_HW)
    qk_acc[...] += jnp.einsum("cp,dp->cd", q, k, preferred_element_type=jnp.float32)
    qsq_acc[...] += jnp.sum(q * q, axis=-1, keepdims=True)
    ksq_acc[...] += jnp.sum(k * k, axis=-1, keepdims=True)

    @pl.when(s == pl.num_programs(2) - 1)
    def _():
        eps = 1e-12
        qn = jnp.maximum(jnp.sqrt(qsq_acc[...]), eps)        # (c_head, 1)
        kn = jnp.maximum(jnp.sqrt(ksq_acc[...]), eps)        # (c_head, 1)
        logits = qk_acc[...] * (t_ref[...] / qn) / kn.T      # (c_head, c_head)
        m = jnp.max(logits, axis=-1, keepdims=True)
        p = jnp.exp(logits - m)
        attn_ref[...] = (p / jnp.sum(p, axis=-1, keepdims=True)).astype(attn_ref.dtype)


def attn_softmax(q4, k4, temperature, t_hw):
    """q4, k4: (B, heads, c_head, HW); temperature: (heads,) -> (B, heads, c_head, c_head)."""
    B, heads, ch, HW = q4.shape
    n_s = HW // t_hw
    temp = temperature.reshape(1, heads, 1, 1).astype(jnp.float32)
    return pl.pallas_call(
        _attn_stats_kernel,
        out_shape=jax.ShapeDtypeStruct((B, heads, ch, ch), jnp.float32),
        grid_spec=pltpu.PrefetchScalarGridSpec(
            num_scalar_prefetch=0,
            grid=(B, heads, n_s),
            in_specs=[
                pl.BlockSpec((None, None, ch, t_hw), lambda b, h, s: (b, h, 0, s)),
                pl.BlockSpec((None, None, ch, t_hw), lambda b, h, s: (b, h, 0, s)),
                pl.BlockSpec((None, None, 1, 1), lambda b, h, s: (0, h, 0, 0)),
            ],
            out_specs=pl.BlockSpec((None, None, ch, ch), lambda b, h, s: (b, h, 0, 0)),
            scratch_shapes=[
                pltpu.VMEM((ch, ch), jnp.float32),
                pltpu.VMEM((ch, 1), jnp.float32),
                pltpu.VMEM((ch, 1), jnp.float32),
            ],
        ),
        compiler_params=pltpu.CompilerParams(
            dimension_semantics=("parallel", "parallel", "arbitrary")),
        cost_estimate=pl.CostEstimate(
            flops=2 * B * heads * ch * ch * HW + 4 * B * heads * ch * HW,
            transcendentals=B * heads * ch * ch,
            bytes_accessed=4 * (2 * B * heads * ch * HW + B * heads * ch * ch)),
    )(q4, k4, temp)


# ----------------------------------------------------------------------------- 
# Kernel 3: fused (attn @ v) per head + project_out 1x1 conv, tiled over HW.
# -----------------------------------------------------------------------------
def _apply_proj_kernel(attn_ref, v_ref, wp_ref, bp_ref, o_ref, tmp_ref, *,
                       num_heads, c_head):
    # attn_ref: (heads, ch, ch), v_ref: (C, T_HW), wp_ref: (C, C), bp_ref: (C, 1)
    for h in range(num_heads):
        lo = h * c_head
        hi = lo + c_head
        tmp_ref[lo:hi, :] = jnp.dot(
            attn_ref[h], v_ref[lo:hi, :], preferred_element_type=jnp.float32)
    out = jnp.dot(wp_ref[...], tmp_ref[...], preferred_element_type=jnp.float32)
    o_ref[...] = (out + bp_ref[...]).astype(o_ref.dtype)


def apply_and_project(attn, v_flat, w_proj, b_proj, t_hw):
    B, heads, ch, _ = attn.shape
    _, C, HW = v_flat.shape
    n_s = HW // t_hw
    bp = b_proj.reshape(C, 1).astype(jnp.float32)
    kernel = functools.partial(_apply_proj_kernel, num_heads=heads, c_head=ch)
    return pl.pallas_call(
        kernel,
        out_shape=jax.ShapeDtypeStruct((B, C, HW), v_flat.dtype),
        grid_spec=pltpu.PrefetchScalarGridSpec(
            num_scalar_prefetch=0,
            grid=(B, n_s),
            in_specs=[
                pl.BlockSpec((None, heads, ch, ch), lambda bb, s: (bb, 0, 0, 0)),
                pl.BlockSpec((None, C, t_hw), lambda bb, s: (bb, 0, s)),
                pl.BlockSpec((C, C), lambda bb, s: (0, 0)),
                pl.BlockSpec((C, 1), lambda bb, s: (0, 0)),
            ],
            out_specs=pl.BlockSpec((None, C, t_hw), lambda bb, s: (bb, 0, s)),
            scratch_shapes=[pltpu.VMEM((C, t_hw), jnp.float32)],
        ),
        compiler_params=pltpu.CompilerParams(
            dimension_semantics=("parallel", "parallel")),
        cost_estimate=pl.CostEstimate(
            flops=2 * B * HW * (heads * ch * ch + C * C),
            transcendentals=0,
            bytes_accessed=4 * (B * heads * ch * ch + 2 * B * C * HW + C * C + C)),
    )(attn, v_flat, w_proj, bp)


# ----------------------------------------------------------------------------- 
# Full forward pass (matches Attention.forward).
# -----------------------------------------------------------------------------
def attention_forward(x, params, num_heads):
    """x: (B, C, H, W) -> (B, C, H, W)."""
    B, C, H, W = x.shape
    HW = H * W
    assert C % num_heads == 0
    ch = C // num_heads
    t_hw = _pick_hw_tile(HW)

    # qkv = qkv_dwconv(qkv(x))
    qkv = pointwise_conv(x.reshape(B, C, HW), params["w_qkv"], params["b_qkv"], t_hw)
    qkv = depthwise_conv3x3(qkv.reshape(B, 3 * C, H, W), params["w_dw"], params["b_dw"])
    qkv = qkv.reshape(B, 3 * C, HW)

    q = qkv[:, 0 * C:1 * C, :].reshape(B, num_heads, ch, HW)
    k = qkv[:, 1 * C:2 * C, :].reshape(B, num_heads, ch, HW)
    v = qkv[:, 2 * C:3 * C, :]                                   # (B, C, HW)

    attn = attn_softmax(q, k, params["temperature"], t_hw)       # (B, heads, ch, ch)
    out = apply_and_project(attn, v, params["w_proj"], params["b_proj"], t_hw)
    return out.reshape(B, C, H, W)


# ----------------------------------------------------------------------------- 
# Pure-JAX reference (mirrors the PyTorch module exactly).
# -----------------------------------------------------------------------------
def reference_attention(x, params, num_heads):
    B, C, H, W = x.shape
    ch = C // num_heads
    qkv = jnp.einsum("oc,bchw->bohw", params["w_qkv"], x) \
        + params["b_qkv"][None, :, None, None]
    qkv = depthwise_conv3x3(qkv, params["w_dw"], params["b_dw"])
    q, k, v = jnp.split(qkv, 3, axis=1)
    q = q.reshape(B, num_heads, ch, H * W)
    k = k.reshape(B, num_heads, ch, H * W)
    v = v.reshape(B, num_heads, ch, H * W)
    qn = q / jnp.maximum(jnp.linalg.norm(q, axis=-1, keepdims=True), 1e-12)
    kn = k / jnp.maximum(jnp.linalg.norm(k, axis=-1, keepdims=True), 1e-12)
    temp = params["temperature"].reshape(1, num_heads, 1, 1)
    attn = jnp.einsum("bhcp,bhdp->bhcd", qn, kn) * temp
    attn = jax.nn.softmax(attn, axis=-1)
    out = jnp.einsum("bhcd,bhdp->bhcp", attn, v).reshape(B, C, H, W)
    out = jnp.einsum("oc,bchw->bohw", params["w_proj"], out) \
        + params["b_proj"][None, :, None, None]
    return out


if __name__ == "__main__":
    B, dim, num_heads, H, W = 2, 32, 4, 32, 32
    key = jax.random.PRNGKey(0)
    ks = jax.random.split(key, 8)
    x = jax.random.normal(ks[0], (B, dim, H, W), dtype=jnp.float32)
    params = {
        "w_qkv": 0.1 * jax.random.normal(ks[1], (3 * dim, dim), jnp.float32),
        "b_qkv": 0.1 * jax.random.normal(ks[2], (3 * dim,), jnp.float32),
        "w_dw": 0.1 * jax.random.normal(ks[3], (3 * dim, 1, 3, 3), jnp.float32),
        "b_dw": 0.1 * jax.random.normal(ks[4], (3 * dim,), jnp.float32),
        "w_proj": 0.1 * jax.random.normal(ks[5], (dim, dim), jnp.float32),
        "b_proj": 0.1 * jax.random.normal(ks[6], (dim,), jnp.float32),
        "temperature": 1.0 + 0.1 * jax.random.normal(ks[7], (num_heads,), jnp.float32),
    }

    out = attention_forward(x, params, num_heads)
    out = jax.block_until_ready(out)
    ref = reference_attention(x, params, num_heads)

    assert out.shape == (B, dim, H, W), out.shape
    assert out.dtype == x.dtype
    max_err = float(jnp.max(jnp.abs(out - ref)))
    assert jnp.allclose(out, ref, atol=2e-3, rtol=2e-3), f"max abs err = {max_err}"
    print("KERNEL_OK")
</pallas_src>

<mosaic_0001>
module attributes {stable_mosaic.version = 11 : i64} {
  func.func @_pointwise_kernel(%arg0: i32, %arg1: i32, %arg2: memref<1x32x512xf32, #tpu.memory_space<vmem>>, %arg3: memref<96x32xf32, #tpu.memory_space<vmem>>, %arg4: memref<96x1xf32, #tpu.memory_space<vmem>>, %arg5: memref<1x96x512xf32, #tpu.memory_space<vmem>>) attributes {dimension_semantics = [#tpu.dimension_semantics<parallel>, #tpu.dimension_semantics<parallel>], iteration_bounds = array<i64: 2, 2>, scalar_prefetch = 0 : i64, scratch_operands = 0 : i64, tpu.core_type = #tpu.core_type<tc>, window_params = [{transform_indices = @transform_0, window_bounds = array<i64: 1, 32, 512>}, {pipeline_mode = #tpu.pipeline_mode<synchronous>, transform_indices = @transform_1, window_bounds = array<i64: 96, 32>}, {pipeline_mode = #tpu.pipeline_mode<synchronous>, transform_indices = @transform_2, window_bounds = array<i64: 96, 1>}, {transform_indices = @transform_3, window_bounds = array<i64: 1, 96, 512>}]} {
    %c0 = arith.constant 0 : index
    %c0_0 = arith.constant 0 : index
    %0 = vector.load %arg3[%c0, %c0_0] : memref<96x32xf32, #tpu.memory_space<vmem>>, vector<96x32xf32>
    %c0_1 = arith.constant 0 : index
    %c0_2 = arith.constant 0 : index
    %c0_3 = arith.constant 0 : index
    %1 = vector.load %arg2[%c0_1, %c0_2, %c0_3] : memref<1x32x512xf32, #tpu.memory_space<vmem>>, vector<1x32x512xf32>
    %2 = vector.shape_cast %1 : vector<1x32x512xf32> to vector<32x512xf32>
    %cst = arith.constant dense<0.000000e+00> : vector<96x512xf32>
    %3 = tpu.matmul %0, %2, %cst {dimension_numbers = #tpu.dot_dimension_numbers<[1], [0], [0], [1], [0, 0, 1, 1], [], []>, precision = #tpu.contract_precision<fp32>} : vector<96x32xf32>, vector<32x512xf32>, vector<96x512xf32> -> vector<96x512xf32>
    %c0_4 = arith.constant 0 : index
    %c0_5 = arith.constant 0 : index
    %4 = vector.load %arg4[%c0_4, %c0_5] : memref<96x1xf32, #tpu.memory_space<vmem>>, vector<96x1xf32>
    %5 = vector.broadcast %4 : vector<96x1xf32> to vector<96x512xf32>
    %6 = arith.addf %3, %5 : vector<96x512xf32>
    %c0_6 = arith.constant 0 : index
    %c0_7 = arith.constant 0 : index
    %c0_8 = arith.constant 0 : index
    %7 = vector.load %arg5[%c0_6, %c0_7, %c0_8] : memref<1x96x512xf32, #tpu.memory_space<vmem>>, vector<1x96x512xf32>
    %8 = vector.shape_cast %7 : vector<1x96x512xf32> to vector<96x512xf32>
    %9 = vector.shape_cast %6 : vector<96x512xf32> to vector<1x96x512xf32>
    tpu.vector_store %arg5[%c0_6, %c0_7, %c0_8], %9 {strides = array<i32>} : memref<1x96x512xf32, #tpu.memory_space<vmem>>, vector<1x96x512xf32>,
    return
  }
  func.func @transform_0(%arg0: i32, %arg1: i32) -> (i32, i32, i32) {
    %c0_i32 = arith.constant 0 : i32
    %c0_i32_0 = arith.constant 0 : i32
    return %arg0, %c0_i32, %arg1 : i32, i32, i32
  }
  func.func @transform_1(%arg0: i32, %arg1: i32) -> (i32, i32) {
    %c0_i32 = arith.constant 0 : i32
    %c0_i32_0 = arith.constant 0 : i32
    %c0_i32_1 = arith.constant 0 : i32
    return %c0_i32, %c0_i32_0 : i32, i32
  }
  func.func @transform_2(%arg0: i32, %arg1: i32) -> (i32, i32) {
    %c0_i32 = arith.constant 0 : i32
    %c0_i32_0 = arith.constant 0 : i32
    %c0_i32_1 = arith.constant 0 : i32
    return %c0_i32, %c0_i32_0 : i32, i32
  }
  func.func @transform_3(%arg0: i32, %arg1: i32) -> (i32, i32, i32) {
    %c0_i32 = arith.constant 0 : i32
    %c0_i32_0 = arith.constant 0 : i32
    return %arg0, %c0_i32, %arg1 : i32, i32, i32
  }
}

</mosaic_0001>

<bundles_post_ra>
// kernel: tpu_custom_call.1
= control target key start
LH: loop header
LB: loop body
LE: loop exit
PB: predicated region body
PF: predicated region fallthrough
CT: control target
= control target key end

     0   :  { %8 = vsyncpa [#allocation3], 0  ;;  %s4295_s0 = inlined_call_operand.hbm [shape: f32[2,32,1024], index: 0, kind: input, shape index: {}]   ;;  %s4296_s1 = inlined_call_operand.vmem [shape: f32[96,32], index: 1, kind: input, shape index: {}]   ;;  %s4297_s2 = inlined_call_operand.vmem [shape: f32[96,1], index: 2, kind: input, shape index: {}]   ;;  %s4298_s3 = inlined_call_operand.hbm [shape: f32[2,96,1024], index: 3, kind: output, shape index: {}]  }
   0x1   :  { %10 = vsyncpa [#allocation3 + $0x1], 0 }
   0x2   :  { %11 = vsyncpa [#allocation4], 0 }
   0x3   :  { %13 = vsyncpa [#allocation4 + $0x1], 0  ;;  %s3312_s12 = smov 0   ;;  %s3314_s13 = smov 0  }
   0x4   :  { %s3316_s14 = smov 0   ;;  %s3318_s15 = smov 0  }
   0x5   :  { %s3320_s16 = smov 0   ;;  %s3322_s17 = smov 0  }
   0x6   :  { %s3324_s18 = smov 0   ;;  %s3326_s19 = smov 0  }
   0x7 LB: > { %s2664_s20 = sadd.s32 4294967295, %s3280_s19   ;;  %s2665_s21 = sadd.s32 4294967294, %s3280_s19   ;;  %s3280_s19 = sphi %s3326_s19, %s19_s19   ;;  %s3276_s18 = sphi %s3324_s18, %s4385_s18   ;;  %s3272_s17 = sphi %s3322_s17, %s4384_s17   ;;  %s3268_s16 = sphi %s3320_s16, %s4383_s16   ;;  %s3264_s15 = sphi %s3318_s15, %s4382_s15   ;;  %s3260_s14 = sphi %s3316_s14, %s4381_s14   ;;  %s3256_s13 = sphi %s3314_s13, %s4380_s13   ;;  %s3252_s12 = sphi %s3312_s12, %s4379_s12  }
   0x8   : > { %s28_s22 = sadd.s32 1, %s3272_s17  ;;  %s31_s23 = sadd.s32 1, %s3276_s18 }
   0x9   : > { %p29_p0 = scmp.ge.s32.totalorder %s28_s22, 2  ;;  %s40_s24 = sadd.s32 1, %s3260_s14 }
   0xa   : > { %p47_p1 = scmp.ne.s32.totalorder %s3260_s14, %s3256_s13  ;;  %p48_p2 = scmp.eq.s32.totalorder %s3280_s19, 0 }
   0xb   : > { %s4387_s22 = smov (%p29_p0, %s28_s22), 0  ;;  %s4389_s23 = smov (!%p29_p0, %s31_s23), %s3276_s18 }
   0xc   : > { %s36_s25 = ssub.s32 %s3272_s17, %s4387_s22  ;;  %p3365_p3 = por %p48_p2, %p47_p1 }
   0xd   : > { %p33_p4 = scmp.ge.s32.totalorder %s4389_s23, 2  ;;  %p53_p5 = scmp.ne.s32.totalorder %s3256_s13, %s3252_s12 }
   0xe   : > { %p54_p6 = scmp.eq.s32.totalorder %s2664_s20, 0  ;;  %p121_p7 = scmp.eq.s32.totalorder %s2664_s20, 3 }
   0xf   : > { %s4391_s23 = smov (%p33_p4, %s4389_s23), 0  ;;  %p127_p10 = scmp.eq.s32.totalorder %s2665_s21, 3 }
  0x10   : > { %p3373_p8 = por %p54_p6, %p53_p5  ;;  %p3377_p9 = por %p121_p7, %p47_p1 }
  0x11   : > { %s35_s29 = ssub.s32 %s3276_s18, %s4391_s23  ;;  %p3383_p12 = por %p127_p10, %p53_p5 }
  0x12   : > { %s4338_s28 = scalar_select %p3377_p9, 1, 0 }
  0x13   : > { %s37_s30 = sor.u32 %s36_s25, %s35_s29  ;;  %p3076_p13 = scmp.lt.s32.totalorder %s3280_s19, 4 }
  0x14   : > { %p38_p11 = scmp.eq.s32.totalorder %s37_s30, 0  ;;  %s153_s5 = sand.u32 1, %s3260_s14  }
  0x15   : > { %s4339_s4 = scalar_select %p3383_p12, 1, 0 }
  0x16   : > { %s3390_s6 = scalar_select %p38_p11, %s3260_s14, %s40_s24  }
  0x17   : > { %s2668_s7 = sshll.u32 %s153_s5, 7  ;;  %s2669_s8 = sshll.u32 %s3272_s17, 2 }
  0x18   : > { %s2670_s9 = sshll.u32 %s3276_s18, 5  ;;  %s157_s10 = scalar_lea.vmem [#allocation2], %s2668_s7 }
  0x19   : > { %s166_s11 = sshll.u32 %s157_s10, 4  ;;  %s163_s20 = sadd.s32 %s2670_s9, %s2669_s8  ;;  %s3394_s11 = int_to_ptr.vmem [resolvable:$true] %s166_s11 }
  0x1a   : > { %s2671_s21 = sshll.u32 %s163_s20, 7  ;;  %p3398_p0 = pnand %p3076_p13, %p3365_p3 }
  0x1b   : > { %s3405_s24 = scalar_lea.hbm %s4295_s0, %s2671_s21  ;;  %s3408_s7 = scalar_lea.sflag [#allocation3], %s153_s5 }
  0x1c   : > { %s3152_s8 = scalar_lea.hbm %s3405_s24, 2048  ;;  %p3154_p3 = pneg %p3398_p0 }
  0x1d   : > { %p3153_p2 = scmp.ne.s32.totalorder %s3405_s24, %s3152_s8  ;;  %s3157_s10 = scalar_lea.hbm %s4295_s0, 8192 }
  0x1e   : > { %p3158_p6 = scmp.lt.u32.totalorder %s3405_s24, %s4295_s0  ;;  %p3159_p7 = scmp.lt.u32.totalorder %s3157_s10, %s3152_s8 }
  0x1f   : > { %p3155_p4 = pnand %p3154_p3, %p3153_p2  ;;  %p3161_p11 = scmp.lt.u32.totalorder %s3152_s8, %s3405_s24 }
  0x20   : > { %p3160_p10 = por %p3159_p7, %p3158_p6 }
  0x21   : > { %p3156_p5 = pneg %p3155_p4 }
  0x22   : > { %p3162_p13 = por %p3161_p11, %p3160_p10 }
  0x24   : > { %p3163_p1 = pnand %p3162_p13, %p3156_p5 }
  0x26   : > { %3166 = shalt.err (!%p3163_p1)
}
  0x27   : > { %s3167_s5 = scalar_lea.vmem %s3394_s11, 2048  ;;  %s3282_s29 = smov [#allocation2]  }
  0x28   : > { %p3168_p2 = scmp.ne.s32.totalorder %s3394_s11, %s3167_s5  ;;  %s3172_s30 = sshll.u32 %s3282_s29, 4  ;;  %s3173_s30 = int_to_ptr.vmem [resolvable:$false] %s3172_s30 }
  0x29   : > { %s3174_s26 = scalar_lea.vmem %s3173_s30, 4096  ;;  %p3175_p9 = scmp.lt.s32.totalorder %s3394_s11, %s3173_s30 }
  0x2a   : > { %p3170_p4 = pnand %p3168_p2, %p3154_p3  ;;  %p3176_p6 = scmp.lt.s32.totalorder %s3174_s26, %s3167_s5 }
  0x2c   : > { %p3171_p12 = pneg %p3170_p4  ;;  %p3177_p7 = por %p3176_p6, %p3175_p9 }
  0x2e   : > { %p3178_p10 = pnand %p3177_p7, %p3171_p12 }
  0x30   : > { %3181 = shalt.err (!%p3178_p10)
}
  0x31   : > { %s3283_s8 = smov 1024   ;;  %s3284_s9 = smov 512  }
  0x32   : > { %s3285_s10 = smov 32   ;;  %p174_p1 = scmp.lt.s32.totalorder %s3280_s19, 5 }
  0x33   : > { %3071 = dma.hbm_to_vmem [thread:$0]  (!%p3398_p0), %s3405_s24, 2048, %s3394_s11, %s3408_s7, %s3283_s8, %s3284_s9, %s3285_s10  }
  0x34   : > { %p4341_p3 = scmp.ge.s32.totalorder %s3280_s19, 1 }
  0x36   : > { %p175_p5 = pnand %p4341_p3, %p174_p1 }
  0x38   : > { %178 = sbr.rel (%p175_p5) target bundleno = 606 (0x25e), region = 32 }
  0x3f   : > { %s3440_s20 = sand.u32 1, %s3256_s13  }
  0x40   : > { %s2673_s21 = sshll.u32 %s3440_s20, 7  ;;  %s181_s5 = scalar_lea.sflag [#allocation3], %s3440_s20 }
  0x41   : > { %s3444_s29 = scalar_lea.vmem [#allocation2], %s2673_s21 }
  0x42   : > { %3243 = dma.done.wait (%p3373_p8), %s181_s5, 2048  }
  0x43   : > { %3245 = vsyncadd (%p3373_p8), %s181_s5, 4294965248  ;;  %v4314_v0 = vmov 0.0   ;;  %v222_v1 = vld [vmem:[%s3444_s29 + $0x8] sm:$0xff]  ;;  %v224_v3 = vld [vmem:[%s3444_s29 + $0x18] sm:$0xff]  ;;  %vm309_vm0 = vcmask 261120   ;;  %s3062_s10 = smul.u32 384, %s3440_s20 }
  0x44   : > { %418 = vmatprep.mubr.f32.mxu0 %v4314_v0  ;;  %1500 = vmatprep.mubr.f32.mxu1 %v4314_v0  ;;  %v226_v2 = vld [vmem:[%s3444_s29 + $0x28] sm:$0xff]  ;;  %v346_v4 = vand.u32 4294901760, %v222_v1  ;;  %v228_v6 = vld [vmem:[%s3444_s29 + $0x38] sm:$0xff]  ;;  %v1428_v7 = vand.u32 4294901760, %v224_v3  ;;  %v221_v8 = vld [vmem:[%s3444_s29] sm:$0xff]  ;;  %s3063_s5 = smul.u32 96, %s3268_s16 }
  0x45   : > { %v350_v5 = vand.u32 4294901760, %v226_v2  ;;  %v225_v9 = vld [vmem:[%s3444_s29 + $0x20] sm:$0xff]  ;;  %v1432_v10 = vand.u32 4294901760, %v228_v6  ;;  %v348_v11 = vand.u32 4294901760, %v221_v8  ;;  %v223_v13 = vld [vmem:[%s3444_s29 + $0x10] sm:$0xff]  ;;  %v230_v15 = vld [vmem:[%s3444_s29 + $0x48] sm:$0xff] }
  0x46   : > { %v352_v12 = vand.u32 4294901760, %v225_v9  ;;  %v227_v14 = vld [vmem:[%s3444_s29 + $0x30] sm:$0xff]  ;;  %v234_v17 = vld [vmem:[%s3444_s29 + $0x68] sm:$0xff]  ;;  %v232_v18 = vld [vmem:[%s3444_s29 + $0x58] sm:$0xff]  ;;  %v3476_v23 = vsub.f32 %v222_v1, %v346_v4  ;;  %v1430_v24 = vand.u32 4294901760, %v223_v13  ;;  %v354_v26 = vand.u32 4294901760, %v230_v15 }
  0x47   : > { %v3461_v16 = vpack.c.bf16 %v350_v5, %v346_v4  ;;  %v3466_v19 = vld [vmem:[%s3444_s29 + $0x78] sm:$0xff]  ;;  %v3468_v20 = vpack.c.bf16 %v1432_v10, %v1428_v7  ;;  %v3473_v22 = vld [vmem:[%s3444_s29 + $0x40] sm:$0xff]  ;;  %v1434_v25 = vand.u32 4294901760, %v227_v14  ;;  %v3478_v27 = vsub.f32 %v226_v2, %v350_v5  ;;  %v3487_v32 = vld [vmem:[%s3444_s29 + $0x50] sm:$0xff]  ;;  %s4183_s21 = scalar_lea.vmem [#allocation5], %s3062_s10  ;;  %s2559_s7 = scalar_lea.sflag [#allocation4], %s3440_s20 }
  0x48   : > { %v3470_v21 = vpack.c.bf16 %v352_v12, %v348_v11  ;;  %v358_v28 = vand.u32 4294901760, %v234_v17  ;;  %v1436_v29 = vand.u32 4294901760, %v232_v18  ;;  %v1440_v30 = vand.u32 4294901760, %v3466_v19  ;;  %v3484_v31 = vld [vmem:[%s3444_s29 + $0x60] sm:$0xff]  ;;  %v3497_v37 = vld [vmem:[%s3444_s29 + $0x70] sm:$0xff]  ;;  %s2674_s29 = sshll.u32 %s3264_s15, 2 }
  0x49   : > { %2679 = vmatprep.subr.bf16.mxu0 %v3461_v16  ;;  %2727 = vmatprep.subr.bf16.mxu1 %v3468_v20  ;;  %v3489_v33 = vsub.f32 %v224_v3, %v1428_v7  ;;  %v3491_v34 = vsub.f32 %v228_v6, %v1432_v10  ;;  %v3493_v35 = vpack.c.bf16 %v1434_v25, %v1430_v24  ;;  %v356_v36 = vand.u32 4294901760, %v3473_v22  ;;  %v209_v38 = vld [vmem:[%s4296_s1] sm:$0xff]  ;;  %s2571_s16 = sadd.s32 %s3063_s5, %s2674_s29  ;;  %s2574_s27 = sshll.u32 %s4183_s21, 4  ;;  %s4237_s27 = int_to_ptr.vmem [resolvable:$true] %s2574_s27 }
  0x4a   : > { %2681 = vmatpush1.bf16.msra.mxu0 %v3470_v21  ;;  %v3502_v39 = vsub.f32 %v221_v8, %v348_v11  ;;  %v3504_v40 = vsub.f32 %v225_v9, %v352_v12  ;;  %v3506_v41 = vpack.c.bf16 %v358_v28, %v354_v26  ;;  %v3510_v42 = vpack.c.bf16 %v1440_v30, %v1436_v29  ;;  %v210_v8 = vld [vmem:[%s4296_s1 + $0x8] sm:$0xff]  ;;  %s2675_s15 = sshll.u32 %s2571_s16, 7  ;;  %s3182_s30 = scalar_lea.vmem %s4237_s27, 6144 }
  0x4b   : > { %2729 = vmatpush1.bf16.msra.mxu1 %v3493_v35  ;;  %v3513_v43 = vsub.f32 %v223_v13, %v1430_v24  ;;  %v3515_v44 = vsub.f32 %v227_v14, %v1434_v25  ;;  %v360_v45 = vand.u32 4294901760, %v3484_v31  ;;  %v1438_v46 = vand.u32 4294901760, %v3487_v32  ;;  %v211_v13 = vld [vmem:[%s4296_s1 + $0x10] sm:$0xff]  ;;  %v212_v24 = vld [vmem:[%s4296_s1 + $0x18] sm:$0xff]  ;;  %s4235_s24 = scalar_lea.hbm %s4298_s3, %s2675_s15  ;;  %p3183_p8 = scmp.ne.s32.totalorder %s4237_s27, %s3182_s30 }
  0x4c   : > { %2683 = vmatprep.subr.bf16.mxu0 %v3506_v41  ;;  %2731 = vmatprep.subr.bf16.mxu1 %v3510_v42  ;;  %v1442_v47 = vand.u32 4294901760, %v3497_v37  ;;  %v311_v48 = vsel %vm309_vm0, %v209_v38, 0  ;;  %v4313_v49 = vand.u32 4294901760, %v3476_v23  ;;  %v4311_v50 = vand.u32 4294901760, %v3478_v27  ;;  %v213_v38 = vld [vmem:[%s4296_s1 + $0x20] sm:$0xff]  ;;  %p4377_p9 = scmp.ne.s32.totalorder %s4338_s28, 0 }
  0x4d   : > { %v3525_v51 = vsub.f32 %v230_v15, %v354_v26  ;;  %v3527_v52 = vsub.f32 %v234_v17, %v358_v28  ;;  %v3533_v53 = vpack.c.bf16 %v360_v45, %v356_v36  ;;  %v3535_v54 = vand.u32 4294901760, %v311_v48  ;;  %s3288_s26 = smov [#allocation5]  }
  0x4e   : > { %v3537_v55 = vsub.f32 %v232_v18, %v1436_v29  ;;  %v3543_v56 = vpack.c.bf16 %v1442_v47, %v1438_v46  ;;  %v554_v57 = vsub.f32 %v3476_v23, %v4313_v49  ;;  %v566_v58 = vsub.f32 %v3478_v27, %v4311_v50  ;;  %p3184_p12 = pnand %p3183_p8, %p4377_p9  ;;  %s3186_s8 = sshll.u32 %s3288_s26, 4  ;;  %s3187_s8 = int_to_ptr.vmem [resolvable:$false] %s3186_s8 }
  0x4f   : > { %2685 = vmatpush1.bf16.msra.mxu0 %v3533_v53  ;;  %v3553_v59 = vsub.f32 %v311_v48, %v3535_v54  ;;  %v4307_v60 = vand.u32 4294901760, %v3489_v33  ;;  %v4306_v61 = vand.u32 4294901760, %v3491_v34  ;;  %v4305_v62 = vand.u32 4294901760, %v3502_v39  ;;  %v214_v48 = vld [vmem:[%s4296_s1 + $0x28] sm:$0xff]  ;;  %s3188_s9 = scalar_lea.vmem %s3187_s8, 12288  ;;  %p3189_p11 = scmp.lt.s32.totalorder %s4237_s27, %s3187_s8 }
  0x50   : > { %2733 = vmatpush1.bf16.msra.mxu1 %v3543_v56  ;;  %v555_v63 = vand.u32 4294901760, %v554_v57  ;;  %v567_v1 = vand.u32 4294901760, %v566_v58  ;;  %v4304_v2 = vand.u32 4294901760, %v3504_v40  ;;  %v4303_v3 = vand.u32 4294901760, %v3513_v43  ;;  %p3185_p0 = pneg %p3184_p12  ;;  %p3190_p13 = scmp.lt.s32.totalorder %s3188_s9, %s3182_s30 }
  0x51   : > { %v3562_v4 = vand.u32 4294901760, %v3553_v59  ;;  %v1636_v5 = vsub.f32 %v3489_v33, %v4307_v60  ;;  %v1648_v6 = vsub.f32 %v3491_v34, %v4306_v61  ;;  %v560_v7 = vsub.f32 %v3502_v39, %v4305_v62 }
  0x52   : > { %v2686_v9 = vpack.c.bf16 %v567_v1, %v555_v63  ;;  %v572_v10 = vsub.f32 %v3504_v40, %v4304_v2  ;;  %v1642_v11 = vsub.f32 %v3513_v43, %v4303_v3  ;;  %v4301_v12 = vand.u32 4294901760, %v3515_v44  ;;  %p3191_p2 = por %p3190_p13, %p3189_p11 }
  0x53   : > { %v422_v14 = vsub.f32 %v3553_v59, %v3562_v4  ;;  %v1637_v15 = vand.u32 4294901760, %v1636_v5  ;;  %v1649_v17 = vand.u32 4294901760, %v1648_v6  ;;  %v561_v18 = vand.u32 4294901760, %v560_v7 }
  0x54   : > { %2687 = vmatprep.subr.bf16.mxu0 %v2686_v9  ;;  %v573_v25 = vand.u32 4294901760, %v572_v10  ;;  %v1643_v26 = vand.u32 4294901760, %v1642_v11  ;;  %v1654_v28 = vsub.f32 %v3515_v44, %v4301_v12  ;;  %v314_v29 = vsel %vm309_vm0, %v210_v8, 0  ;;  %v215_v9 = vld [vmem:[%s4296_s1 + $0x30] sm:$0xff]  ;;  %p3192_p4 = pnand %p3191_p2, %p3185_p0 }
  0x55   : > { %v423_v57 = vand.u32 4294901760, %v422_v14  ;;  %v2734_v58 = vpack.c.bf16 %v1649_v17, %v1637_v15  ;;  %v3601_v63 = vand.u32 4294901760, %v314_v29  ;;  %v317_v1 = vsel %vm309_vm0, %v211_v13, 0 }
  0x56   : > { %v2688_v5 = vpack.c.bf16 %v573_v25, %v561_v18  ;;  %v1655_v6 = vand.u32 4294901760, %v1654_v28  ;;  %v3604_v7 = vand.u32 4294901760, %v317_v1  ;;  %v320_v8 = vsel %vm309_vm0, %v212_v24, 0 }
  0x57   : > { %424 = vmatmul.mubr.f32.vlgmr.msra.gmra.mrb[0].mxu0 %v423_v57  ;;  %1506 = vmatmul.mubr.f32.vlgmr.msra.gmra.mrb[0].mxu1 %v423_v57  ;;  %v3611_v10 = vsub.f32 %v314_v29, %v3601_v63  ;;  %v3613_v11 = vand.u32 4294901760, %v320_v8  ;;  %v323_v14 = vsel %vm309_vm0, %v213_v38, 0  ;;  %v326_v13 = vsel %vm309_vm0, %v214_v48, 0 }
  0x58   : > { %2735 = vmatprep.subr.bf16.mxu1 %v2734_v58  ;;  %2689 = vmatpush1.bf16.msra.mxu0 %v2688_v5  ;;  %v2736_v15 = vpack.c.bf16 %v1655_v6, %v1643_v26  ;;  %v3618_v17 = vsub.f32 %v317_v1, %v3604_v7  ;;  %v3620_v18 = vand.u32 4294901760, %v323_v14  ;;  %v3622_v24 = vand.u32 4294901760, %v326_v13 }
  0x59   : > { %429 = vmatprep.mubr.f32.mxu0 %v4314_v0  ;;  %1511 = vmatprep.mubr.f32.mxu1 %v4314_v0  ;;  %v3627_v25 = vand.u32 4294901760, %v3611_v10  ;;  %v3630_v28 = vsub.f32 %v320_v8, %v3613_v11  ;;  %v329_v29 = vsel %vm309_vm0, %v215_v9, 0  ;;  %v4300_v26 = vand.u32 4294901760, %v3525_v51 }
  0x5a   : > { %v3637_v38 = vsub.f32 %v3466_v19, %v1440_v30  ;;  %v3642_v48 = vsub.f32 %v3473_v22, %v356_v36  ;;  %2737 = vmatpush1.bf16.msra.mxu1 %v2736_v15  ;;  %v3645_v57 = vand.u32 4294901760, %v3618_v17  ;;  %v3648_v58 = vsub.f32 %v323_v14, %v3620_v18 }
  0x5b   : > { %4342 = vst [vmem:[#allocation8_spill] sm:$0xff] %v3627_v25  ;;  %v433_v1 = vsub.f32 %v3611_v10, %v3627_v25  ;;  %v3653_v5 = vand.u32 4294901760, %v3630_v28  ;;  %v578_v19 = vsub.f32 %v3525_v51, %v4300_v26  ;;  %v4302_v22 = vand.u32 4294901760, %v3527_v52 }
  0x5c   : > { %4343 = vst [vmem:[#allocation9_spill] sm:$0xff] %v3645_v57  ;;  %v444_v30 = vsub.f32 %v3618_v17, %v3645_v57  ;;  %v3662_v36 = vand.u32 4294901760, %v3648_v58  ;;  %v3665_v6 = vsub.f32 %v326_v13, %v3622_v24  ;;  %v3667_v8 = vand.u32 4294901760, %v329_v29 }
  0x5d   : > { %4344 = vst [vmem:[#allocation10_spill] sm:$0xff] %v3653_v5  ;;  %v3672_v9 = vsub.f32 %v3484_v31, %v360_v45  ;;  %v434_v14 = vand.u32 4294901760, %v433_v1  ;;  %v579_v15 = vand.u32 4294901760, %v578_v19  ;;  %v590_v26 = vsub.f32 %v3527_v52, %v4302_v22 }
  0x5e   : > { %4345 = vst [vmem:[#allocation11_spill] sm:$0xff] %v3662_v36  ;;  %v3680_v12 = vsub.f32 %v3487_v32, %v1438_v46  ;;  %v3685_v13 = vsub.f32 %v3497_v37, %v1442_v47  ;;  %v455_v31 = vsub.f32 %v3630_v28, %v3653_v5  ;;  %v445_v45 = vand.u32 4294901760, %v444_v30 }
  0x5f   : > { %435 = vmatmul.mubr.f32.gmra.mrb[2].mxu0 %v434_v14  ;;  %1517 = vmatmul.mubr.f32.gmra.mrb[2].mxu1 %v434_v14  ;;  %v591_v1 = vand.u32 4294901760, %v590_v26  ;;  %v4308_v19 = vand.u32 4294901760, %v3537_v55  ;;  %v4309_v22 = vand.u32 4294901760, %v3637_v38  ;;  %v466_v32 = vsub.f32 %v3648_v58, %v3662_v36  ;;  %v216_v26 = vld [vmem:[%s4296_s1 + $0x38] sm:$0xff] }
  0x60   : > { %440 = vmatprep.mubr.f32.mxu0 %v4314_v0  ;;  %1522 = vmatprep.mubr.f32.mxu1 %v4314_v0  ;;  %v3696_v37 = vand.u32 4294901760, %v3665_v6  ;;  %v3699_v46 = vsub.f32 %v329_v29, %v3667_v8  ;;  %v4310_v47 = vand.u32 4294901760, %v3642_v48  ;;  %v4312_v2 = vand.u32 4294901760, %v3672_v9 }
  0x61   : > { %v2690_v30 = vpack.c.bf16 %v591_v1, %v579_v15  ;;  %v1660_v14 = vsub.f32 %v3537_v55, %v4308_v19  ;;  %v1672_v3 = vsub.f32 %v3637_v38, %v4309_v22  ;;  %v456_v62 = vand.u32 4294901760, %v455_v31  ;;  %v217_v15 = vld [vmem:[%s4296_s1 + $0x40] sm:$0xff] }
  0x62   : > { %v584_v29 = vsub.f32 %v3642_v48, %v4310_v47  ;;  %v4316_v61 = vand.u32 4294901760, %v3680_v12  ;;  %v4319_v60 = vand.u32 4294901760, %v3685_v13  ;;  %v596_v31 = vsub.f32 %v3672_v9, %v4312_v2 }
  0x63   : > { %446 = vmatmul.mubr.f32.gmra.mrb[4].mxu0 %v445_v45  ;;  %1528 = vmatmul.mubr.f32.gmra.mrb[4].mxu1 %v445_v45  ;;  %v1661_v1 = vand.u32 4294901760, %v1660_v14  ;;  %v1673_v19 = vand.u32 4294901760, %v1672_v3  ;;  %v332_v22 = vsel %vm309_vm0, %v216_v26, 0  ;;  %v218_v14 = vld [vmem:[%s4296_s1 + $0x48] sm:$0xff]  ;;  %v3738_v26 = vand.u32 4294901760, %v3699_v46 }
  0x64   : > { %451 = vmatprep.mubr.f32.mxu0 %v4314_v0  ;;  %1533 = vmatprep.mubr.f32.mxu1 %v4314_v0  ;;  %v585_v47 = vand.u32 4294901760, %v584_v29  ;;  %v1666_v50 = vsub.f32 %v3680_v12, %v4316_v61  ;;  %v1678_v45 = vsub.f32 %v3685_v13, %v4319_v60  ;;  %v3732_v3 = vand.u32 4294901760, %v332_v22 }
  0x65   : > { %2691 = vmatprep.subr.bf16.mxu0 %v2690_v30  ;;  %v2738_v2 = vpack.c.bf16 %v1673_v19, %v1661_v1  ;;  %v597_v29 = vand.u32 4294901760, %v596_v31  ;;  %v335_v49 = vsel %vm309_vm0, %v217_v15, 0  ;;  %v467_v0 = vand.u32 4294901760, %v466_v32 }
  0x66   : > { %v477_v61 = vsub.f32 %v3665_v6, %v3696_v37  ;;  %v1667_v36 = vand.u32 4294901760, %v1666_v50  ;;  %v1679_v60 = vand.u32 4294901760, %v1678_v45  ;;  %v3744_v57 = vsub.f32 %v332_v22, %v3732_v3  ;;  %v219_v50 = vld [vmem:[%s4296_s1 + $0x50] sm:$0xff] }
  0x67   : > { %457 = vmatmul.mubr.f32.gmra.mrb[6].mxu0 %v456_v62  ;;  %1539 = vmatmul.mubr.f32.gmra.mrb[6].mxu1 %v456_v62  ;;  %v2692_v5 = vpack.c.bf16 %v597_v29, %v585_v47  ;;  %v3746_v25 = vand.u32 4294901760, %v335_v49  ;;  %v338_v30 = vsel %vm309_vm0, %v218_v14, 0  ;;  %v4346_v19 = vmov 0.0  }
  0x68   : > { %462 = vmatprep.mubr.f32.mxu0 %v4346_v19  ;;  %1544 = vmatprep.mubr.f32.mxu1 %v4346_v19  ;;  %v2740_v32 = vpack.c.bf16 %v1679_v60, %v1667_v36  ;;  %v488_v62 = vsub.f32 %v3699_v46, %v3738_v26  ;;  %v2694_v22 = vpack.c.bf16 %v3478_v27, %v3476_v23  ;;  %v3760_v15 = vand.u32 4294901760, %v338_v30  ;;  %v220_v60 = vld [vmem:[%s4296_s1 + $0x58] sm:$0xff] }
  0x69   : > { %2739 = vmatprep.subr.bf16.mxu1 %v2738_v2  ;;  %2693 = vmatpush1.bf16.msra.mxu0 %v2692_v5  ;;  %v2742_v47 = vpack.c.bf16 %v3491_v34, %v3489_v33  ;;  %v478_v36 = vand.u32 4294901760, %v477_v61  ;;  %v3766_v1 = vand.u32 4294901760, %v3744_v57  ;;  %v3769_v2 = vsub.f32 %v335_v49, %v3746_v25 }
  0x6a   : > { %2741 = vmatpush1.bf16.msra.mxu1 %v2740_v32  ;;  %v341_v5 = vsel %vm309_vm0, %v219_v50, 0  ;;  %v489_v31 = vand.u32 4294901760, %v488_v62  ;;  %v344_v45 = vsel %vm309_vm0, %v220_v60, 0  ;;  %2695 = vmatprep.subr.bf16.mxu0 %v2694_v22  ;;  %v4348_v14 = vand.u32 4294901760, %v3476_v23 }
  0x6b   : > { %468 = vmatmul.mubr.f32.gmra.mrb[8].mxu0 %v467_v0  ;;  %1550 = vmatmul.mubr.f32.gmra.mrb[8].mxu1 %v467_v0  ;;  %4347 = vst [vmem:[#allocation12_spill] sm:$0xff] %v3766_v1  ;;  %v3776_v0 = vsub.f32 %v338_v30, %v3760_v15  ;;  %v3778_v61 = vand.u32 4294901760, %v341_v5  ;;  %v4349_v49 = vand.u32 4294901760, %v3478_v27  ;;  %v4350_v32 = vand.u32 4294901760, %v3489_v33 }
  0x6c   : > { %473 = vmatprep.mubr.f32.mxu0 %v4346_v19  ;;  %1555 = vmatprep.mubr.f32.mxu1 %v4346_v19  ;;  %v4351_v50 = vand.u32 4294901760, %v3491_v34  ;;  %v499_v30 = vsub.f32 %v3744_v57, %v3766_v1  ;;  %v3795_v22 = vand.u32 4294901760, %v3769_v2  ;;  %v4353_v23 = vand.u32 4294901760, %v3502_v39 }
  0x6d   : > { %2743 = vmatprep.subr.bf16.mxu1 %v2742_v47  ;;  %v3784_v29 = vpack.c.bf16 %v4349_v49, %v4348_v14  ;;  %v4354_v27 = vand.u32 4294901760, %v3504_v40  ;;  %v4355_v33 = vand.u32 4294901760, %v3513_v43  ;;  %v4356_v34 = vand.u32 4294901760, %v3515_v44 }
  0x6e   : > { %v3790_v62 = vpack.c.bf16 %v4351_v50, %v4350_v32  ;;  %4352 = vst [vmem:[#allocation13_spill] sm:$0xff] %v3795_v22  ;;  %v500_v14 = vand.u32 4294901760, %v499_v30  ;;  %v510_v49 = vsub.f32 %v3769_v2, %v3795_v22  ;;  %v3816_v32 = vand.u32 4294901760, %v3776_v0 }
  0x6f   : > { %479 = vmatmul.mubr.f32.gmra.mrb[10].mxu0 %v478_v36  ;;  %1561 = vmatmul.mubr.f32.gmra.mrb[10].mxu1 %v478_v36  ;;  %v3801_v47 = vpack.c.bf16 %v4354_v27, %v4353_v23  ;;  %v3807_v60 = vpack.c.bf16 %v4356_v34, %v4355_v33  ;;  %v3811_v36 = vand.u32 4294901760, %v344_v45  ;;  %v3819_v50 = vsub.f32 %v341_v5, %v3778_v61 }
  0x70   : > { %484 = vmatprep.mubr.f32.mxu0 %v4346_v19  ;;  %1566 = vmatprep.mubr.f32.mxu1 %v4346_v19  ;;  %4357 = vst [vmem:[#allocation14_spill] sm:$0xff] %v3816_v32  ;;  %v511_v23 = vand.u32 4294901760, %v510_v49  ;;  %v4365_v22 = vand.u32 4294901760, %v3672_v9 }
  0x71   : > { %v3826_v30 = vand.u32 4294901760, %v3819_v50  ;;  %v3829_v27 = vsub.f32 %v344_v45, %v3811_v36 }
  0x73   : > { %490 = vmatmul.mubr.f32.gmra.mrb[12].mxu0 %v489_v31  ;;  %1572 = vmatmul.mubr.f32.gmra.mrb[12].mxu1 %v489_v31  ;;  %v521_v31 = vsub.f32 %v3776_v0, %v3816_v32  ;;  %4358 = vst [vmem:[#allocation15_spill] sm:$0xff] %v3826_v30  ;;  %v532_v33 = vsub.f32 %v3819_v50, %v3826_v30  ;;  %v3836_v34 = vand.u32 4294901760, %v3829_v27  ;;  %v4362_v32 = vand.u32 4294901760, %v3537_v55 }
  0x74   : > { %495 = vmatprep.mubr.f32.mxu0 %v4346_v19  ;;  %1577 = vmatprep.mubr.f32.mxu1 %v4346_v19 }
  0x75   : > { %v522_v5 = vand.u32 4294901760, %v521_v31  ;;  %4359 = vst [vmem:[#allocation16_spill] sm:$0xff] %v3836_v34  ;;  %v533_v45 = vand.u32 4294901760, %v532_v33  ;;  %v4361_v31 = vand.u32 4294901760, %v3527_v52 }
  0x77   : > { %501 = vmatmul.mubr.f32.gmra.mrb[14].mxu0 %v500_v14  ;;  %1583 = vmatmul.mubr.f32.gmra.mrb[14].mxu1 %v500_v14  ;;  %v543_v14 = vsub.f32 %v3829_v27, %v3836_v34  ;;  %v4364_v34 = vand.u32 4294901760, %v3642_v48 }
  0x78   : > { %506 = vmatprep.mubr.f32.mxu0 %v4346_v19  ;;  %1588 = vmatprep.mubr.f32.mxu1 %v4346_v19 }
  0x79   : > { %v544_v49 = vand.u32 4294901760, %v543_v14  ;;  %v3860_v1 = vpack.c.bf16 %v4365_v22, %v4364_v34  ;;  %v4367_v14 = vand.u32 4294901760, %v3685_v13  ;;  %v2696_v22 = vpack.c.bf16 %v3504_v40, %v3502_v39 }
  0x7a   : > { %v2698_v34 = vpack.c.bf16 %v3527_v52, %v3525_v51  ;;  %v2700_v39 = vpack.c.bf16 %v3672_v9, %v3642_v48  ;;  %v2748_v40 = vpack.c.bf16 %v3685_v13, %v3680_v12  ;;  %v237_v52 = vld [vmem:[%s4297_s2] sm:$0xff]  ;;  %v246_v48 = vld [vmem:[%s4297_s2 + $0x48] sm:$0xff]  ;;  %v247_v9 = vld [vmem:[%s4297_s2 + $0x50] sm:$0xff] }
  0x7b   : > { %512 = vmatmul.mubr.f32.gmra.mrb[16].mxu0 %v511_v23  ;;  %1594 = vmatmul.mubr.f32.gmra.mrb[16].mxu1 %v511_v23  ;;  %v4360_v23 = vand.u32 4294901760, %v3525_v51  ;;  %v4370_v51 = vld [vmem:[#allocation10_spill] sm:$0xff] }
  0x7c   : > { %517 = vmatprep.mubr.f32.mxu0 %v4346_v19  ;;  %1599 = vmatprep.mubr.f32.mxu1 %v4346_v19  ;;  %v4374_v13 = vld [vmem:[#allocation14_spill] sm:$0xff] }
  0x7d   : > { %v3848_v30 = vpack.c.bf16 %v4361_v31, %v4360_v23  ;;  %v2746_v31 = vpack.c.bf16 %v3637_v38, %v3537_v55  ;;  %v4371_v55 = vld [vmem:[#allocation11_spill] sm:$0xff] }
  0x7f   : > { %523 = vmatmul.mubr.f32.gmra.mrb[18].mxu0 %v522_v5  ;;  %1605 = vmatmul.mubr.f32.gmra.mrb[18].mxu1 %v522_v5  ;;  %v4363_v5 = vand.u32 4294901760, %v3637_v38  ;;  %v4372_v38 = vld [vmem:[#allocation12_spill] sm:$0xff] }
  0x80   : > { %528 = vmatprep.mubr.f32.mxu0 %v4346_v19  ;;  %1610 = vmatprep.mubr.f32.mxu1 %v4346_v19 }
  0x81   : > { %v3854_v33 = vpack.c.bf16 %v4363_v5, %v4362_v32  ;;  %v2744_v32 = vpack.c.bf16 %v3515_v44, %v3513_v43  ;;  %v4368_v43 = vld [vmem:[#allocation8_spill] sm:$0xff]  ;;  %v4369_v44 = vld [vmem:[#allocation9_spill] sm:$0xff] }
  0x83   : > { %534 = vmatmul.mubr.f32.gmra.mrb[20].mxu0 %v533_v45  ;;  %1616 = vmatmul.mubr.f32.gmra.mrb[20].mxu1 %v533_v45  ;;  %v4366_v45 = vand.u32 4294901760, %v3680_v12  ;;  %v242_v12 = vld [vmem:[%s4297_s2 + $0x28] sm:$0xff] }
  0x84   : > { %539 = vmatprep.mubr.f32.mxu0 %v4346_v19  ;;  %1621 = vmatprep.mubr.f32.mxu1 %v4346_v19 }
  0x85   : > { %v3868_v23 = vpack.c.bf16 %v4367_v14, %v4366_v45 }
  0x87   : > { %545 = vmatmul.mubr.f32.gmra.mrb[22].mxu0 %v544_v49  ;;  %1627 = vmatmul.mubr.f32.gmra.mrb[22].mxu1 %v544_v49 }
  0x88   : > { %655 = vmatprep.mubr.f32.mxu0 %v4346_v19  ;;  %1737 = vmatprep.mubr.f32.mxu1 %v4346_v19 }
  0x8b   : > { %657 = vmatmul.mubr.f32.vlgmr.msra.gmra.mrb[0].mxu0 %v3535_v54  ;;  %1739 = vmatmul.mubr.f32.vlgmr.msra.gmra.mrb[0].mxu1 %v3535_v54 }
  0x8c   : > { %2697 = vmatpush1.bf16.msra.mxu0 %v2696_v22  ;;  %2745 = vmatpush1.bf16.msra.mxu1 %v2744_v32 }
  0x8d   : > { %662 = vmatprep.mubr.f32.mxu0 %v4346_v19  ;;  %1744 = vmatprep.mubr.f32.mxu1 %v4346_v19 }
  0x8e   : > { %2699 = vmatprep.subr.bf16.mxu0 %v2698_v34  ;;  %2747 = vmatprep.subr.bf16.mxu1 %v2746_v31 }
  0x8f   : > { %664 = vmatmul.mubr.f32.gmra.mrb[2].mxu0 %v3601_v63  ;;  %1746 = vmatmul.mubr.f32.gmra.mrb[2].mxu1 %v3601_v63 }
  0x90   : > { %669 = vmatprep.mubr.f32.mxu0 %v4346_v19  ;;  %1751 = vmatprep.mubr.f32.mxu1 %v4346_v19 }
  0x91   : > { %2701 = vmatpush1.bf16.msra.mxu0 %v2700_v39  ;;  %2749 = vmatpush1.bf16.msra.mxu1 %v2748_v40 }
  0x92   : > { %2703 = vmatprep.subr.bf16.mxu0 %v3461_v16  ;;  %2751 = vmatprep.subr.bf16.mxu1 %v3468_v20 }
  0x93   : > { %671 = vmatmul.mubr.f32.gmra.mrb[4].mxu0 %v3604_v7  ;;  %1753 = vmatmul.mubr.f32.gmra.mrb[4].mxu1 %v3604_v7 }
  0x94   : > { %676 = vmatprep.mubr.f32.mxu0 %v4346_v19  ;;  %1758 = vmatprep.mubr.f32.mxu1 %v4346_v19 }
  0x97   : > { %678 = vmatmul.mubr.f32.gmra.mrb[6].mxu0 %v3613_v11  ;;  %1760 = vmatmul.mubr.f32.gmra.mrb[6].mxu1 %v3613_v11 }
  0x98   : > { %683 = vmatprep.mubr.f32.mxu0 %v4346_v19  ;;  %1765 = vmatprep.mubr.f32.mxu1 %v4346_v19 }
  0x9b   : > { %685 = vmatmul.mubr.f32.gmra.mrb[8].mxu0 %v3620_v18  ;;  %1767 = vmatmul.mubr.f32.gmra.mrb[8].mxu1 %v3620_v18 }
  0x9c   : > { %690 = vmatprep.mubr.f32.mxu0 %v4346_v19  ;;  %1772 = vmatprep.mubr.f32.mxu1 %v4346_v19 }
  0x9f   : > { %692 = vmatmul.mubr.f32.gmra.mrb[10].mxu0 %v3622_v24  ;;  %1774 = vmatmul.mubr.f32.gmra.mrb[10].mxu1 %v3622_v24 }
  0xa0   : > { %697 = vmatprep.mubr.f32.mxu0 %v4346_v19  ;;  %1779 = vmatprep.mubr.f32.mxu1 %v4346_v19 }
  0xa3   : > { %699 = vmatmul.mubr.f32.gmra.mrb[12].mxu0 %v3667_v8  ;;  %1781 = vmatmul.mubr.f32.gmra.mrb[12].mxu1 %v3667_v8 }
  0xa4   : > { %704 = vmatprep.mubr.f32.mxu0 %v4346_v19  ;;  %1786 = vmatprep.mubr.f32.mxu1 %v4346_v19 }
  0xa7   : > { %706 = vmatmul.mubr.f32.gmra.mrb[14].mxu0 %v3732_v3  ;;  %1788 = vmatmul.mubr.f32.gmra.mrb[14].mxu1 %v3732_v3 }
  0xa8   : > { %711 = vmatprep.mubr.f32.mxu0 %v4346_v19  ;;  %1793 = vmatprep.mubr.f32.mxu1 %v4346_v19 }
  0xab   : > { %713 = vmatmul.mubr.f32.gmra.mrb[16].mxu0 %v3746_v25  ;;  %1795 = vmatmul.mubr.f32.gmra.mrb[16].mxu1 %v3746_v25 }
  0xac   : > { %718 = vmatprep.mubr.f32.mxu0 %v4346_v19  ;;  %1800 = vmatprep.mubr.f32.mxu1 %v4346_v19 }
  0xaf   : > { %720 = vmatmul.mubr.f32.gmra.mrb[18].mxu0 %v3760_v15  ;;  %1802 = vmatmul.mubr.f32.gmra.mrb[18].mxu1 %v3760_v15 }
  0xb0   : > { %725 = vmatprep.mubr.f32.mxu0 %v4346_v19  ;;  %1807 = vmatprep.mubr.f32.mxu1 %v4346_v19 }
  0xb3   : > { %727 = vmatmul.mubr.f32.gmra.mrb[20].mxu0 %v3778_v61  ;;  %1809 = vmatmul.mubr.f32.gmra.mrb[20].mxu1 %v3778_v61 }
  0xb4   : > { %732 = vmatprep.mubr.f32.mxu0 %v4346_v19  ;;  %1814 = vmatprep.mubr.f32.mxu1 %v4346_v19 }
  0xb7   : > { %734 = vmatmul.mubr.f32.gmra.mrb[22].mxu0 %v3811_v36  ;;  %1816 = vmatmul.mubr.f32.gmra.mrb[22].mxu1 %v3811_v36 }
  0xb8   : > { %820 = vmatprep.mubr.f32.mxu0 %v4346_v19  ;;  %1902 = vmatprep.mubr.f32.mxu1 %v4346_v19 }
  0xbb   : > { %823 = vmatmul.mubr.f32.vlgmr.msra.gmra.mrb[0].mxu0 %v3553_v59  ;;  %1905 = vmatmul.mubr.f32.vlgmr.msra.gmra.mrb[0].mxu1 %v3553_v59  ;;  %v238_v59 = vld [vmem:[%s4297_s2 + $0x8] sm:$0xff] }
  0xbc   : > { %2705 = vmatpush1.bf16.msra.mxu0 %v3470_v21  ;;  %2753 = vmatpush1.bf16.msra.mxu1 %v3493_v35 }
  0xbd   : > { %828 = vmatprep.mubr.f32.mxu0 %v4346_v19  ;;  %1910 = vmatprep.mubr.f32.mxu1 %v4346_v19 }
  0xbe   : > { %2707 = vmatprep.subr.bf16.mxu0 %v3506_v41  ;;  %2755 = vmatprep.subr.bf16.mxu1 %v3510_v42 }
  0xbf   : > { %831 = vmatmul.mubr.f32.gmra.mrb[2].mxu0 %v3611_v10  ;;  %1913 = vmatmul.mubr.f32.gmra.mrb[2].mxu1 %v3611_v10  ;;  %v241_v10 = vld [vmem:[%s4297_s2 + $0x20] sm:$0xff] }
  0xc0   : > { %836 = vmatprep.mubr.f32.mxu0 %v4346_v19  ;;  %1918 = vmatprep.mubr.f32.mxu1 %v4346_v19 }
  0xc1   : > { %2709 = vmatpush1.bf16.msra.mxu0 %v3533_v53  ;;  %2757 = vmatpush1.bf16.msra.mxu1 %v3543_v56 }
  0xc2   : > { %2711 = vmatprep.subr.bf16.mxu0 %v3784_v29  ;;  %2759 = vmatprep.subr.bf16.mxu1 %v3790_v62 }
  0xc3   : > { %839 = vmatmul.mubr.f32.gmra.mrb[4].mxu0 %v3618_v17  ;;  %1921 = vmatmul.mubr.f32.gmra.mrb[4].mxu1 %v3618_v17  ;;  %v244_v17 = vld [vmem:[%s4297_s2 + $0x38] sm:$0xff] }
  0xc4   : > { %844 = vmatprep.mubr.f32.mxu0 %v4346_v19  ;;  %1926 = vmatprep.mubr.f32.mxu1 %v4346_v19 }
  0xc7   : > { %847 = vmatmul.mubr.f32.gmra.mrb[6].mxu0 %v3630_v28  ;;  %1929 = vmatmul.mubr.f32.gmra.mrb[6].mxu1 %v3630_v28  ;;  %v243_v28 = vld [vmem:[%s4297_s2 + $0x30] sm:$0xff] }
  0xc8   : > { %852 = vmatprep.mubr.f32.mxu0 %v4346_v19  ;;  %1934 = vmatprep.mubr.f32.mxu1 %v4346_v19 }
  0xcb   : > { %855 = vmatmul.mubr.f32.gmra.mrb[8].mxu0 %v3648_v58  ;;  %1937 = vmatmul.mubr.f32.gmra.mrb[8].mxu1 %v3648_v58  ;;  %v4373_v58 = vld [vmem:[#allocation13_spill] sm:$0xff] }
  0xcc   : > { %860 = vmatprep.mubr.f32.mxu0 %v4346_v19  ;;  %1942 = vmatprep.mubr.f32.mxu1 %v4346_v19 }
  0xcf   : > { %863 = vmatmul.mubr.f32.gmra.mrb[10].mxu0 %v3665_v6  ;;  %1945 = vmatmul.mubr.f32.gmra.mrb[10].mxu1 %v3665_v6  ;;  %v248_v6 = vld [vmem:[%s4297_s2 + $0x58] sm:$0xff] }
  0xd0   : > { %868 = vmatprep.mubr.f32.mxu0 %v4346_v19  ;;  %1950 = vmatprep.mubr.f32.mxu1 %v4346_v19 }
  0xd3   : > { %871 = vmatmul.mubr.f32.gmra.mrb[12].mxu0 %v3699_v46  ;;  %1953 = vmatmul.mubr.f32.gmra.mrb[12].mxu1 %v3699_v46  ;;  %v4376_v46 = vld [vmem:[#allocation16_spill] sm:$0xff] }
  0xd4   : > { %876 = vmatprep.mubr.f32.mxu0 %v4346_v19  ;;  %1958 = vmatprep.mubr.f32.mxu1 %v4346_v19 }
  0xd7   : > { %879 = vmatmul.mubr.f32.gmra.mrb[14].mxu0 %v3744_v57  ;;  %1961 = vmatmul.mubr.f32.gmra.mrb[14].mxu1 %v3744_v57  ;;  %v245_v57 = vld [vmem:[%s4297_s2 + $0x40] sm:$0xff] }
  0xd8   : > { %884 = vmatprep.mubr.f32.mxu0 %v4346_v19  ;;  %1966 = vmatprep.mubr.f32.mxu1 %v4346_v19 }
  0xdb   : > { %887 = vmatmul.mubr.f32.gmra.mrb[16].mxu0 %v3769_v2  ;;  %1969 = vmatmul.mubr.f32.gmra.mrb[16].mxu1 %v3769_v2 }
  0xdc   : > { %892 = vmatprep.mubr.f32.mxu0 %v4346_v19  ;;  %1974 = vmatprep.mubr.f32.mxu1 %v4346_v19 }
  0xdf   : > { %895 = vmatmul.mubr.f32.gmra.mrb[18].mxu0 %v3776_v0  ;;  %1977 = vmatmul.mubr.f32.gmra.mrb[18].mxu1 %v3776_v0 }
  0xe0   : > { %900 = vmatprep.mubr.f32.mxu0 %v4346_v19  ;;  %1982 = vmatprep.mubr.f32.mxu1 %v4346_v19 }
  0xe3   : > { %903 = vmatmul.mubr.f32.gmra.mrb[20].mxu0 %v3819_v50  ;;  %1985 = vmatmul.mubr.f32.gmra.mrb[20].mxu1 %v3819_v50 }
  0xe4   : > { %908 = vmatprep.mubr.f32.mxu0 %v4346_v19  ;;  %1990 = vmatprep.mubr.f32.mxu1 %v4346_v19 }
  0xe7   : > { %911 = vmatmul.mubr.f32.gmra.mrb[22].mxu0 %v3829_v27  ;;  %1993 = vmatmul.mubr.f32.gmra.mrb[22].mxu1 %v3829_v27 }
  0xe8   : > { %989 = vmatprep.mubr.f32.mxu0 %v4346_v19  ;;  %2071 = vmatprep.mubr.f32.mxu1 %v4346_v19 }
  0xeb   : > { %993 = vmatmul.mubr.f32.vlgmr.msra.gmra.mrb[0].mxu0 %v3562_v4  ;;  %2075 = vmatmul.mubr.f32.vlgmr.msra.gmra.mrb[0].mxu1 %v3562_v4  ;;  %v240_v4 = vld [vmem:[%s4297_s2 + $0x18] sm:$0xff] }
  0xec   : > { %2713 = vmatpush1.bf16.msra.mxu0 %v3801_v47  ;;  %2761 = vmatpush1.bf16.msra.mxu1 %v3807_v60 }
  0xed   : > { %998 = vmatprep.mubr.f32.mxu0 %v4346_v19  ;;  %2080 = vmatprep.mubr.f32.mxu1 %v4346_v19 }
  0xee   : > { %2715 = vmatprep.subr.bf16.mxu0 %v3848_v30  ;;  %2763 = vmatprep.subr.bf16.mxu1 %v3854_v33 }
  0xef   : > { %1002 = vmatmul.mubr.f32.gmra.mrb[2].mxu0 %v4368_v43  ;;  %2084 = vmatmul.mubr.f32.gmra.mrb[2].mxu1 %v4368_v43 }
  0xf0   : > { %1007 = vmatprep.mubr.f32.mxu0 %v4346_v19  ;;  %2089 = vmatprep.mubr.f32.mxu1 %v4346_v19 }
  0xf1   : > { %2717 = vmatpush1.bf16.msra.mxu0 %v3860_v1  ;;  %2765 = vmatpush1.bf16.msra.mxu1 %v3868_v23 }
  0xf2   : > { %2719 = vmatprep.subr.bf16.mxu0 %v3461_v16  ;;  %2767 = vmatprep.subr.bf16.mxu1 %v3468_v20  ;;  %v239_v16 = vld [vmem:[%s4297_s2 + $0x10] sm:$0xff]  ;;  %v3287_v20 = vmov 0  }
  0xf3   : > { %1011 = vmatmul.mubr.f32.gmra.mrb[4].mxu0 %v4369_v44  ;;  %2093 = vmatmul.mubr.f32.gmra.mrb[4].mxu1 %v4369_v44 }
  0xf4   : > { %1016 = vmatprep.mubr.f32.mxu0 %v4346_v19  ;;  %2098 = vmatprep.mubr.f32.mxu1 %v4346_v19 }
  0xf5   : > { %3150 = vset.pattern.permute.xlu0 %v3287_v20  ;;  %3151 = vset.pattern.permute.xlu1 %v3287_v20 }
  0xf6   : > { %251 = vperm.xlu0 %3150, %v237_v52   ;;  %261 = vperm.xlu1 %3151, %v239_v16  }
  0xf7   : > { %1020 = vmatmul.mubr.f32.gmra.mrb[6].mxu0 %v4370_v51  ;;  %2102 = vmatmul.mubr.f32.gmra.mrb[6].mxu1 %v4370_v51 }
  0xf8   : > { %1025 = vmatprep.mubr.f32.mxu0 %v4346_v19  ;;  %2107 = vmatprep.mubr.f32.mxu1 %v4346_v19 }
  0xfa   : > { %256 = vperm.xlu0 %3150, %v238_v59   ;;  %266 = vperm.xlu1 %3151, %v240_v4  }
  0xfb   : > { %1029 = vmatmul.mubr.f32.gmra.mrb[8].mxu0 %v4371_v55  ;;  %2111 = vmatmul.mubr.f32.gmra.mrb[8].mxu1 %v4371_v55 }
  0xfc   : > { %1034 = vmatprep.mubr.f32.mxu0 %v4346_v19  ;;  %2116 = vmatprep.mubr.f32.mxu1 %v4346_v19 }
  0xfe   : > { %276 = vperm.xlu1 %3151, %v242_v12   ;;  %271 = vperm.xlu0 %3150, %v241_v10  }
  0xff   : > { %1038 = vmatmul.mubr.f32.gmra.mrb[10].mxu0 %v3696_v37  ;;  %2120 = vmatmul.mubr.f32.gmra.mrb[10].mxu1 %v3696_v37  ;;  %v4375_v37 = vld [vmem:[#allocation15_spill] sm:$0xff] }
 0x100   : > { %1043 = vmatprep.mubr.f32.mxu0 %v4346_v19  ;;  %2125 = vmatprep.mubr.f32.mxu1 %v4346_v19 }
 0x102   : > { %286 = vperm.xlu1 %3151, %v244_v17   ;;  %281 = vperm.xlu0 %3150, %v243_v28  }
 0x103   : > { %1047 = vmatmul.mubr.f32.gmra.mrb[12].mxu0 %v3738_v26  ;;  %2129 = vmatmul.mubr.f32.gmra.mrb[12].mxu1 %v3738_v26 }
 0x104   : > { %1052 = vmatprep.mubr.f32.mxu0 %v4346_v19  ;;  %2134 = vmatprep.mubr.f32.mxu1 %v4346_v19 }
 0x106   : > { %296 = vperm.xlu1 %3151, %v246_v48   ;;  %291 = vperm.xlu0 %3150, %v245_v57  }
 0x107   : > { %1056 = vmatmul.mubr.f32.gmra.mrb[14].mxu0 %v4372_v38  ;;  %2138 = vmatmul.mubr.f32.gmra.mrb[14].mxu1 %v4372_v38 }
 0x108   : > { %1061 = vmatprep.mubr.f32.mxu0 %v4346_v19  ;;  %2143 = vmatprep.mubr.f32.mxu1 %v4346_v19 }
 0x10a   : > { %306 = vperm.xlu1 %3151, %v248_v6   ;;  %301 = vperm.xlu0 %3150, %v247_v9  }
 0x10b   : > { %1065 = vmatmul.mubr.f32.gmra.mrb[16].mxu0 %v4373_v58  ;;  %2147 = vmatmul.mubr.f32.gmra.mrb[16].mxu1 %v4373_v58 }
 0x10c   : > { %1070 = vmatprep.mubr.f32.mxu0 %v4346_v19  ;;  %2152 = vmatprep.mubr.f32.mxu1 %v4346_v19 }
 0x10f   : > { %1074 = vmatmul.mubr.f32.gmra.mrb[18].mxu0 %v4374_v13  ;;  %2156 = vmatmul.mubr.f32.gmra.mrb[18].mxu1 %v4374_v13 }
 0x110   : > { %1079 = vmatprep.mubr.f32.mxu0 %v4346_v19  ;;  %2161 = vmatprep.mubr.f32.mxu1 %v4346_v19 }
 0x113   : > { %1083 = vmatmul.mubr.f32.gmra.mrb[20].mxu0 %v4375_v37  ;;  %2165 = vmatmul.mubr.f32.gmra.mrb[20].mxu1 %v4375_v37 }
 0x114   : > { %1088 = vmatprep.mubr.f32.mxu0 %v4346_v19  ;;  %2170 = vmatprep.mubr.f32.mxu1 %v4346_v19 }
 0x117   : > { %1092 = vmatmul.mubr.f32.gmra.mrb[22].mxu0 %v4376_v46  ;;  %2174 = vmatmul.mubr.f32.gmra.mrb[22].mxu1 %v4376_v46 }
 0x118   : > { %1186 = vmatprep.mubr.f32.mxu0 %v4346_v19  ;;  %2268 = vmatprep.mubr.f32.mxu1 %v4346_v19 }
 0x11b   : > { %1188 = vmatmul.mubr.f32.vlgmr.msra.gmra.mrb[0].mxu0 %v3535_v54  ;;  %2270 = vmatmul.mubr.f32.vlgmr.msra.gmra.mrb[0].mxu1 %v3535_v54 }
 0x11c   : > { %2721 = vmatpush1.bf16.msra.mxu0 %v3470_v21  ;;  %2769 = vmatpush1.bf16.msra.mxu1 %v3493_v35 }
 0x11d   : > { %1193 = vmatprep.mubr.f32.mxu0 %v4346_v19  ;;  %2275 = vmatprep.mubr.f32.mxu1 %v4346_v19 }
 0x11e   : > { %2723 = vmatprep.subr.bf16.mxu0 %v3506_v41  ;;  %2771 = vmatprep.subr.bf16.mxu1 %v3510_v42 }
 0x11f   : > { %1195 = vmatmul.mubr.f32.gmra.mrb[2].mxu0 %v3601_v63  ;;  %2277 = vmatmul.mubr.f32.gmra.mrb[2].mxu1 %v3601_v63 }
 0x120   : > { %1200 = vmatprep.mubr.f32.mxu0 %v4346_v19  ;;  %2282 = vmatprep.mubr.f32.mxu1 %v4346_v19 }
 0x121   : > { %2725 = vmatpush1.bf16.msra.mxu0 %v3533_v53  ;;  %2773 = vmatpush1.bf16.msra.mxu1 %v3543_v56 }
 0x123   : > { %1202 = vmatmul.mubr.f32.gmra.mrb[4].mxu0 %v3604_v7  ;;  %2284 = vmatmul.mubr.f32.gmra.mrb[4].mxu1 %v3604_v7 }
 0x124   : > { %1207 = vmatprep.mubr.f32.mxu0 %v4346_v19  ;;  %2289 = vmatprep.mubr.f32.mxu1 %v4346_v19 }
 0x127   : > { %1209 = vmatmul.mubr.f32.gmra.mrb[6].mxu0 %v3613_v11  ;;  %2291 = vmatmul.mubr.f32.gmra.mrb[6].mxu1 %v3613_v11 }
 0x128   : > { %1214 = vmatprep.mubr.f32.mxu0 %v4346_v19  ;;  %2296 = vmatprep.mubr.f32.mxu1 %v4346_v19 }
 0x12b   : > { %1216 = vmatmul.mubr.f32.gmra.mrb[8].mxu0 %v3620_v18  ;;  %2298 = vmatmul.mubr.f32.gmra.mrb[8].mxu1 %v3620_v18 }
 0x12c   : > { %1221 = vmatprep.mubr.f32.mxu0 %v4346_v19  ;;  %2303 = vmatprep.mubr.f32.mxu1 %v4346_v19 }
 0x12f   : > { %1223 = vmatmul.mubr.f32.gmra.mrb[10].mxu0 %v3622_v24  ;;  %2305 = vmatmul.mubr.f32.gmra.mrb[10].mxu1 %v3622_v24 }
 0x130   : > { %1228 = vmatprep.mubr.f32.mxu0 %v4346_v19  ;;  %2310 = vmatprep.mubr.f32.mxu1 %v4346_v19 }
 0x133   : > { %1230 = vmatmul.mubr.f32.gmra.mrb[12].mxu0 %v3667_v8  ;;  %2312 = vmatmul.mubr.f32.gmra.mrb[12].mxu1 %v3667_v8 }
 0x134   : > { %1235 = vmatprep.mubr.f32.mxu0 %v4346_v19  ;;  %2317 = vmatprep.mubr.f32.mxu1 %v4346_v19 }
 0x137   : > { %1237 = vmatmul.mubr.f32.gmra.mrb[14].mxu0 %v3732_v3  ;;  %2319 = vmatmul.mubr.f32.gmra.mrb[14].mxu1 %v3732_v3 }
 0x138   : > { %1242 = vmatprep.mubr.f32.mxu0 %v4346_v19  ;;  %2324 = vmatprep.mubr.f32.mxu1 %v4346_v19 }
 0x13b   : > { %1244 = vmatmul.mubr.f32.gmra.mrb[16].mxu0 %v3746_v25  ;;  %2326 = vmatmul.mubr.f32.gmra.mrb[16].mxu1 %v3746_v25 }
 0x13c   : > { %1249 = vmatprep.mubr.f32.mxu0 %v4346_v19  ;;  %2331 = vmatprep.mubr.f32.mxu1 %v4346_v19 }
 0x13f   : > { %1251 = vmatmul.mubr.f32.gmra.mrb[18].mxu0 %v3760_v15  ;;  %2333 = vmatmul.mubr.f32.gmra.mrb[18].mxu1 %v3760_v15 }
 0x140   : > { %1256 = vmatprep.mubr.f32.mxu0 %v4346_v19  ;;  %2338 = vmatprep.mubr.f32.mxu1 %v4346_v19 }
 0x143   : > { %1258 = vmatmul.mubr.f32.gmra.mrb[20].mxu0 %v3778_v61  ;;  %2340 = vmatmul.mubr.f32.gmra.mrb[20].mxu1 %v3778_v61 }
 0x144   : > { %1263 = vmatprep.mubr.f32.mxu0 %v4346_v19  ;;  %2345 = vmatprep.mubr.f32.mxu1 %v4346_v19 }
 0x147   : > { %1265 = vmatmul.mubr.f32.gmra.mrb[22].mxu0 %v3811_v36  ;;  %2347 = vmatmul.mubr.f32.gmra.mrb[22].mxu1 %v3811_v36 }
 0x148   : > { %1343 = vmatprep.mubr.f32.mxu0 %v4346_v19  ;;  %2425 = vmatprep.mubr.f32.mxu1 %v4346_v19 }
 0x14b   : > { %1345 = vmatmul.mubr.f32.vlgmr.msra.gmra.mrb[0].mxu0 %v3535_v54  ;;  %2427 = vmatmul.mubr.f32.vlgmr.msra.gmra.mrb[0].mxu1 %v3535_v54 }
 0x14c   : > { %1350 = vmatprep.mubr.f32.mxu0 %v4346_v19  ;;  %2432 = vmatprep.mubr.f32.mxu1 %v4346_v19 }
 0x14f   : > { %1352 = vmatmul.mubr.f32.gmra.mrb[2].mxu0 %v3601_v63  ;;  %2434 = vmatmul.mubr.f32.gmra.mrb[2].mxu1 %v3601_v63 }
 0x150   : > { %1357 = vmatprep.mubr.f32.mxu0 %v4346_v19  ;;  %2439 = vmatprep.mubr.f32.mxu1 %v4346_v19 }
 0x153   : > { %1359 = vmatmul.mubr.f32.gmra.mrb[4].mxu0 %v3604_v7  ;;  %2441 = vmatmul.mubr.f32.gmra.mrb[4].mxu1 %v3604_v7 }
 0x154   : > { %1364 = vmatprep.mubr.f32.mxu0 %v4346_v19  ;;  %2446 = vmatprep.mubr.f32.mxu1 %v4346_v19 }
 0x157   : > { %1366 = vmatmul.mubr.f32.gmra.mrb[6].mxu0 %v3613_v11  ;;  %2448 = vmatmul.mubr.f32.gmra.mrb[6].mxu1 %v3613_v11 }
 0x158   : > { %1371 = vmatprep.mubr.f32.mxu0 %v4346_v19  ;;  %2453 = vmatprep.mubr.f32.mxu1 %v4346_v19 }
 0x15b   : > { %1373 = vmatmul.mubr.f32.gmra.mrb[8].mxu0 %v3620_v18  ;;  %2455 = vmatmul.mubr.f32.gmra.mrb[8].mxu1 %v3620_v18 }
 0x15c   : > { %1378 = vmatprep.mubr.f32.mxu0 %v4346_v19  ;;  %2460 = vmatprep.mubr.f32.mxu1 %v4346_v19 }
 0x15f   : > { %1380 = vmatmul.mubr.f32.gmra.mrb[10].mxu0 %v3622_v24  ;;  %2462 = vmatmul.mubr.f32.gmra.mrb[10].mxu1 %v3622_v24 }
 0x160   : > { %1385 = vmatprep.mubr.f32.mxu0 %v4346_v19  ;;  %2467 = vmatprep.mubr.f32.mxu1 %v4346_v19 }
 0x163   : > { %1387 = vmatmul.mubr.f32.gmra.mrb[12].mxu0 %v3667_v8  ;;  %2469 = vmatmul.mubr.f32.gmra.mrb[12].mxu1 %v3667_v8 }
 0x164   : > { %1392 = vmatprep.mubr.f32.mxu0 %v4346_v19  ;;  %2474 = vmatprep.mubr.f32.mxu1 %v4346_v19 }
 0x167   : > { %1394 = vmatmul.mubr.f32.gmra.mrb[14].mxu0 %v3732_v3  ;;  %2476 = vmatmul.mubr.f32.gmra.mrb[14].mxu1 %v3732_v3 }
 0x168   : > { %1399 = vmatprep.mubr.f32.mxu0 %v4346_v19  ;;  %2481 = vmatprep.mubr.f32.mxu1 %v4346_v19 }
 0x16b   : > { %1401 = vmatmul.mubr.f32.gmra.mrb[16].mxu0 %v3746_v25  ;;  %2483 = vmatmul.mubr.f32.gmra.mrb[16].mxu1 %v3746_v25 }
 0x16c   : > { %1406 = vmatprep.mubr.f32.mxu0 %v4346_v19  ;;  %2488 = vmatprep.mubr.f32.mxu1 %v4346_v19 }
 0x16f   : > { %1408 = vmatmul.mubr.f32.gmra.mrb[18].mxu0 %v3760_v15  ;;  %2490 = vmatmul.mubr.f32.gmra.mrb[18].mxu1 %v3760_v15 }
 0x170   : > { %1413 = vmatprep.mubr.f32.mxu0 %v4346_v19  ;;  %2495 = vmatprep.mubr.f32.mxu1 %v4346_v19 }
 0x173   : > { %1415 = vmatmul.mubr.f32.gmra.mrb[20].mxu0 %v3778_v61  ;;  %2497 = vmatmul.mubr.f32.gmra.mrb[20].mxu1 %v3778_v61 }
 0x174   : > { %1420 = vmatprep.mubr.f32.mxu0 %v4346_v19  ;;  %2502 = vmatprep.mubr.f32.mxu1 %v4346_v19 }
 0x175   : > { %v252_v21 = vpop.permute.xlu0 %251  ;;  %v262_v18 = vpop.permute.xlu1 %261 }
 0x177   : > { %1422 = vmatmul.mubr.f32.gmra.mrb[22].mxu0 %v3811_v36  ;;  %2504 = vmatmul.mubr.f32.gmra.mrb[22].mxu1 %v3811_v36 }
 0x179   : > { %v257_v11 = vpop.permute.xlu0 %256  ;;  %v267_v50 = vpop.permute.xlu1 %266 }
 0x17d   : > { %v272_v22 = vpop.permute.xlu0 %271  ;;  %v277_v52 = vpop.permute.xlu1 %276 }
 0x181   : > { %v282_v28 = vpop.permute.xlu0 %281  ;;  %v287_v46 = vpop.permute.xlu1 %286 }
 0x21e   : > { %v1346_v35 = vpop.f32.mrb[0].mxu0  ;;  %v2428_v41 = vpop.f32.mrb[0].mxu1 }
 0x21f   : > { %v2774_v42 = vadd.f32 %v1346_v35, %v252_v21  ;;  %v2798_v53 = vadd.f32 %v2428_v41, %v252_v21  ;;  %v1348_v54 = vpop.f32.mrb[1].mxu0  ;;  %v2430_v56 = vpop.f32.mrb[1].mxu1 }
 0x220   : > { %v2775_v63 = vadd.f32 %v1348_v54, %v252_v21  ;;  %v2799_v7 = vadd.f32 %v2430_v56, %v252_v21 }
 0x221   : > { %2510 = vst [vmem:[%s4183_s21] sm:$0xff] %v2774_v42  ;;  %2512 = vst [vmem:[%s4183_s21 + $0x10] sm:$0xff] %v2798_v53 }
 0x222   : > { %2511 = vst [vmem:[%s4183_s21 + $0x8] sm:$0xff] %v2775_v63  ;;  %2513 = vst [vmem:[%s4183_s21 + $0x18] sm:$0xff] %v2799_v7  ;;  %v1353_v24 = vpop.f32.mrb[2].mxu0  ;;  %v2435_v25 = vpop.f32.mrb[2].mxu1 }
 0x223   : > { %v2776_v8 = vadd.f32 %v1353_v24, %v257_v11  ;;  %v2800_v3 = vadd.f32 %v2435_v25, %v257_v11  ;;  %v1355_v26 = vpop.f32.mrb[3].mxu0  ;;  %v2437_v19 = vpop.f32.mrb[3].mxu1 }
 0x224   : > { %v2777_v15 = vadd.f32 %v1355_v26, %v257_v11  ;;  %v2801_v1 = vadd.f32 %v2437_v19, %v257_v11  ;;  %v292_v7 = vpop.permute.xlu0 %291 }
 0x225   : > { %2514 = vst [vmem:[%s4183_s21 + $0x20] sm:$0xff] %v2776_v8  ;;  %2516 = vst [vmem:[%s4183_s21 + $0x30] sm:$0xff] %v2800_v3 }
 0x226   : > { %2515 = vst [vmem:[%s4183_s21 + $0x28] sm:$0xff] %v2777_v15  ;;  %2517 = vst [vmem:[%s4183_s21 + $0x38] sm:$0xff] %v2801_v1  ;;  %v1360_v2 = vpop.f32.mrb[4].mxu0  ;;  %v2442_v0 = vpop.f32.mrb[4].mxu1 }
 0x227   : > { %v2778_v61 = vadd.f32 %v1360_v2, %v262_v18  ;;  %v2802_v29 = vadd.f32 %v2442_v0, %v262_v18  ;;  %v1362_v62 = vpop.f32.mrb[5].mxu0  ;;  %v2444_v47 = vpop.f32.mrb[5].mxu1 }
 0x228   : > { %v2779_v60 = vadd.f32 %v1362_v62, %v262_v18  ;;  %v2803_v36 = vadd.f32 %v2444_v47, %v262_v18  ;;  %v297_v15 = vpop.permute.xlu1 %296 }
 0x229   : > { %2518 = vst [vmem:[%s4183_s21 + $0x40] sm:$0xff] %v2778_v61  ;;  %2520 = vst [vmem:[%s4183_s21 + $0x50] sm:$0xff] %v2802_v29 }
 0x22a   : > { %2519 = vst [vmem:[%s4183_s21 + $0x48] sm:$0xff] %v2779_v60  ;;  %2521 = vst [vmem:[%s4183_s21 + $0x58] sm:$0xff] %v2803_v36  ;;  %v1367_v30 = vpop.f32.mrb[6].mxu0  ;;  %v2449_v27 = vpop.f32.mrb[6].mxu1 }
 0x22b   : > { %v2780_v49 = vadd.f32 %v1367_v30, %v267_v50  ;;  %v2804_v5 = vadd.f32 %v2449_v27, %v267_v50  ;;  %v1369_v33 = vpop.f32.mrb[7].mxu0  ;;  %v2451_v45 = vpop.f32.mrb[7].mxu1 }
 0x22c   : > { %v2781_v14 = vadd.f32 %v1369_v33, %v267_v50  ;;  %v2805_v23 = vadd.f32 %v2451_v45, %v267_v50  ;;  %v302_v36 = vpop.permute.xlu0 %301 }
 0x22d   : > { %2522 = vst [vmem:[%s4183_s21 + $0x60] sm:$0xff] %v2780_v49  ;;  %2524 = vst [vmem:[%s4183_s21 + $0x70] sm:$0xff] %v2804_v5 }
 0x22e   : > { %2523 = vst [vmem:[%s4183_s21 + $0x68] sm:$0xff] %v2781_v14  ;;  %2525 = vst [vmem:[%s4183_s21 + $0x78] sm:$0xff] %v2805_v23  ;;  %v1374_v32 = vpop.f32.mrb[8].mxu0  ;;  %v2456_v34 = vpop.f32.mrb[8].mxu1 }
 0x22f   : > { %v2782_v31 = vadd.f32 %v1374_v32, %v272_v22  ;;  %v2806_v39 = vadd.f32 %v2456_v34, %v272_v22  ;;  %v1376_v40 = vpop.f32.mrb[9].mxu0  ;;  %v2458_v43 = vpop.f32.mrb[9].mxu1 }
 0x230   : > { %v2783_v44 = vadd.f32 %v1376_v40, %v272_v22  ;;  %v2807_v51 = vadd.f32 %v2458_v43, %v272_v22  ;;  %v307_v23 = vpop.permute.xlu1 %306 }
 0x231   : > { %2526 = vst [vmem:[%s4183_s21 + $0x80] sm:$0xff] %v2782_v31  ;;  %2528 = vst [vmem:[%s4183_s21 + $0x90] sm:$0xff] %v2806_v39 }
 0x232   : > { %2527 = vst [vmem:[%s4183_s21 + $0x88] sm:$0xff] %v2783_v44  ;;  %2529 = vst [vmem:[%s4183_s21 + $0x98] sm:$0xff] %v2807_v51  ;;  %v1381_v16 = vpop.f32.mrb[10].mxu0  ;;  %v2463_v20 = vpop.f32.mrb[10].mxu1 }
 0x233   : > { %v2784_v55 = vadd.f32 %v1381_v16, %v277_v52  ;;  %v2808_v59 = vadd.f32 %v2463_v20, %v277_v52  ;;  %v1383_v4 = vpop.f32.mrb[11].mxu0  ;;  %v2465_v12 = vpop.f32.mrb[11].mxu1 }
 0x234   : > { %v2785_v10 = vadd.f32 %v1383_v4, %v277_v52  ;;  %v2809_v17 = vadd.f32 %v2465_v12, %v277_v52 }
 0x235   : > { %2530 = vst [vmem:[%s4183_s21 + $0xa0] sm:$0xff] %v2784_v55  ;;  %2532 = vst [vmem:[%s4183_s21 + $0xb0] sm:$0xff] %v2808_v59 }
 0x236   : > { %2531 = vst [vmem:[%s4183_s21 + $0xa8] sm:$0xff] %v2785_v10  ;;  %2533 = vst [vmem:[%s4183_s21 + $0xb8] sm:$0xff] %v2809_v17  ;;  %v1388_v38 = vpop.f32.mrb[12].mxu0  ;;  %v2470_v48 = vpop.f32.mrb[12].mxu1 }
 0x237   : > { %v2786_v57 = vadd.f32 %v1388_v38, %v282_v28  ;;  %v2810_v58 = vadd.f32 %v2470_v48, %v282_v28  ;;  %v1390_v6 = vpop.f32.mrb[13].mxu0  ;;  %v2472_v9 = vpop.f32.mrb[13].mxu1 }
 0x238   : > { %v2787_v13 = vadd.f32 %v1390_v6, %v282_v28  ;;  %v2811_v37 = vadd.f32 %v2472_v9, %v282_v28 }
 0x239   : > { %2534 = vst [vmem:[%s4183_s21 + $0xc0] sm:$0xff] %v2786_v57  ;;  %2536 = vst [vmem:[%s4183_s21 + $0xd0] sm:$0xff] %v2810_v58 }
 0x23a   : > { %2535 = vst [vmem:[%s4183_s21 + $0xc8] sm:$0xff] %v2787_v13  ;;  %2537 = vst [vmem:[%s4183_s21 + $0xd8] sm:$0xff] %v2811_v37  ;;  %v1395_v21 = vpop.f32.mrb[14].mxu0  ;;  %v2477_v35 = vpop.f32.mrb[14].mxu1 }
 0x23b   : > { %v2788_v41 = vadd.f32 %v1395_v21, %v287_v46  ;;  %v2812_v42 = vadd.f32 %v2477_v35, %v287_v46  ;;  %v1397_v53 = vpop.f32.mrb[15].mxu0  ;;  %v2479_v54 = vpop.f32.mrb[15].mxu1 }
 0x23c   : > { %v2789_v56 = vadd.f32 %v1397_v53, %v287_v46  ;;  %v2813_v63 = vadd.f32 %v2479_v54, %v287_v46 }
 0x23d   : > { %2538 = vst [vmem:[%s4183_s21 + $0xe0] sm:$0xff] %v2788_v41  ;;  %2540 = vst [vmem:[%s4183_s21 + $0xf0] sm:$0xff] %v2812_v42 }
 0x23e   : > { %2539 = vst [vmem:[%s4183_s21 + $0xe8] sm:$0xff] %v2789_v56  ;;  %2541 = vst [vmem:[%s4183_s21 + $0xf8] sm:$0xff] %v2813_v63  ;;  %v1402_v11 = vpop.f32.mrb[16].mxu0  ;;  %v2484_v18 = vpop.f32.mrb[16].mxu1 }
 0x23f   : > { %v2790_v24 = vadd.f32 %v1402_v11, %v292_v7  ;;  %v2814_v25 = vadd.f32 %v2484_v18, %v292_v7  ;;  %v1404_v8 = vpop.f32.mrb[17].mxu0  ;;  %v2486_v3 = vpop.f32.mrb[17].mxu1 }
 0x240   : > { %v2791_v26 = vadd.f32 %v1404_v8, %v292_v7  ;;  %v2815_v19 = vadd.f32 %v2486_v3, %v292_v7 }
 0x241   : > { %2542 = vst [vmem:[%s4183_s21 + $0x100] sm:$0xff] %v2790_v24  ;;  %2544 = vst [vmem:[%s4183_s21 + $0x110] sm:$0xff] %v2814_v25 }
 0x242   : > { %2543 = vst [vmem:[%s4183_s21 + $0x108] sm:$0xff] %v2791_v26  ;;  %2545 = vst [vmem:[%s4183_s21 + $0x118] sm:$0xff] %v2815_v19  ;;  %v1409_v1 = vpop.f32.mrb[18].mxu0  ;;  %v2491_v2 = vpop.f32.mrb[18].mxu1 }
 0x243   : > { %v2792_v0 = vadd.f32 %v1409_v1, %v297_v15  ;;  %v2816_v61 = vadd.f32 %v2491_v2, %v297_v15  ;;  %v1411_v29 = vpop.f32.mrb[19].mxu0  ;;  %v2493_v62 = vpop.f32.mrb[19].mxu1 }
 0x244   : > { %v2793_v47 = vadd.f32 %v1411_v29, %v297_v15  ;;  %v2817_v60 = vadd.f32 %v2493_v62, %v297_v15 }
 0x245   : > { %2546 = vst [vmem:[%s4183_s21 + $0x120] sm:$0xff] %v2792_v0  ;;  %2548 = vst [vmem:[%s4183_s21 + $0x130] sm:$0xff] %v2816_v61 }
 0x246   : > { %2547 = vst [vmem:[%s4183_s21 + $0x128] sm:$0xff] %v2793_v47  ;;  %2549 = vst [vmem:[%s4183_s21 + $0x138] sm:$0xff] %v2817_v60  ;;  %v1416_v50 = vpop.f32.mrb[20].mxu0  ;;  %v2498_v30 = vpop.f32.mrb[20].mxu1 }
 0x247   : > { %v2794_v27 = vadd.f32 %v1416_v50, %v302_v36  ;;  %v2818_v49 = vadd.f32 %v2498_v30, %v302_v36  ;;  %v1418_v5 = vpop.f32.mrb[21].mxu0  ;;  %v2500_v33 = vpop.f32.mrb[21].mxu1 }
 0x248   : > { %v2795_v45 = vadd.f32 %v1418_v5, %v302_v36  ;;  %v2819_v14 = vadd.f32 %v2500_v33, %v302_v36 }
 0x249   : > { %2550 = vst [vmem:[%s4183_s21 + $0x140] sm:$0xff] %v2794_v27  ;;  %2552 = vst [vmem:[%s4183_s21 + $0x150] sm:$0xff] %v2818_v49 }
 0x24a   : > { %2551 = vst [vmem:[%s4183_s21 + $0x148] sm:$0xff] %v2795_v45  ;;  %2553 = vst [vmem:[%s4183_s21 + $0x158] sm:$0xff] %v2819_v14  ;;  %v1423_v22 = vpop.f32.mrb[22].mxu0  ;;  %v2505_v32 = vpop.f32.mrb[22].mxu1 }
 0x24b   : > { %v2796_v34 = vadd.f32 %v1423_v22, %v307_v23  ;;  %v2820_v31 = vadd.f32 %v2505_v32, %v307_v23  ;;  %v1425_v39 = vpop.f32.mrb[23].mxu0  ;;  %v2507_v40 = vpop.f32.mrb[23].mxu1 }
 0x24c   : > { %v2797_v43 = vadd.f32 %v1425_v39, %v307_v23  ;;  %v2821_v44 = vadd.f32 %v2507_v40, %v307_v23 }
 0x24d   : > { %2554 = vst [vmem:[%s4183_s21 + $0x160] sm:$0xff] %v2796_v34  ;;  %2556 = vst [vmem:[%s4183_s21 + $0x170] sm:$0xff] %v2820_v31 }
 0x24e   : > { %2555 = vst [vmem:[%s4183_s21 + $0x168] sm:$0xff] %v2797_v43  ;;  %2557 = vst [vmem:[%s4183_s21 + $0x178] sm:$0xff] %v2821_v44 }
 0x24f   : > { %3195 = shalt.err (!%p3192_p4)
}
 0x250   : > { %s3196_s10 = scalar_lea.hbm %s4235_s24, 6144  ;;  %s3200_s29 = scalar_lea.hbm %s4298_s3, 24576 }
 0x251   : > { %p3197_p6 = scmp.ne.s32.totalorder %s4235_s24, %s3196_s10  ;;  %p3201_p1 = scmp.lt.u32.totalorder %s4235_s24, %s4298_s3 }
 0x252   : > { %p3202_p3 = scmp.lt.u32.totalorder %s3200_s29, %s3196_s10  ;;  %p3204_p8 = scmp.lt.u32.totalorder %s3196_s10, %s4235_s24 }
 0x253   : > { %p3198_p7 = pnand %p3197_p6, %p4377_p9 }
 0x254   : > { %p3203_p5 = por %p3202_p3, %p3201_p1 }
 0x255   : > { %p3199_p10 = pneg %p3198_p7 }
 0x256   : > { %p3205_p12 = por %p3204_p8, %p3203_p5 }
 0x258   : > { %p3206_p0 = pnand %p3205_p12, %p3199_p10 }
 0x25a   : > { %3209 = shalt.err (!%p3206_p0)
}
 0x25b   : > { %s3289_s11 = smov 512   ;;  %s3290_s25 = smov 1024  }
 0x25c   : > { %s3291_s30 = smov 32  }
 0x25d   : > { %3066 = dma.vmem_to_hbm [thread:$0]  (%p4377_p9), %s4237_s27, 6144, %s4235_s24, %s2559_s7, %s3289_s11, %s3290_s25, %s3291_s30  }
 0x25e PF: > { %p3077_p11 = scmp.ge.s32.totalorder %s3280_s19, 2  ;;  %s2589_s26 = sand.u32 1, %s3252_s12  }
 0x25f   : > { %p4378_p13 = scmp.ne.s32.totalorder %s4339_s4, 0  ;;  %s2590_s8 = scalar_lea.sflag [#allocation4], %s2589_s26 }
 0x261   : > { %p3073_p2 = pnand %p3077_p11, %p4378_p13 }
 0x263   : > { %3247 = dma.done.wait (!%p3073_p2), %s2590_s8, 6144  }
 0x264   : > { %3249 = vsyncadd (!%p3073_p2), %s2590_s8, 4294961152  ;;  %s19_s19 = sadd.s32 1, %s3280_s19   ;;  %s4379_s12 = smov %s3256_s13 }
 0x265   : > { %p16_p4 = scmp.ge.s32.totalorder %s19_s19, 6   ;;  %s4380_s13 = smov %s3260_s14 }
 0x266   : > { %s4381_s14 = smov %s3390_s6  ;;  %s4382_s15 = smov %s3272_s17 }
 0x267   : > { %s4383_s16 = smov %s3276_s18  ;;  %s4384_s17 = smov %s4387_s22 }
 0x268   : > { %s4385_s18 = smov %s4391_s23  ;;  %18 = sbr.rel (!%p16_p4) target bundleno = 7 (0x7), region = 77 }
 0x26f   :  { %2595 = vsyncpa [#allocation3], 1 }
 0x270   :  { %2597 = vsyncpa [#allocation3 + $0x1], 1 }
 0x271   :  { %2598 = vsyncpa [#allocation4], 1 }
 0x272   :  { %2600 = vsyncpa [#allocation4 + $0x1], 1 }

</bundles_post_ra>
